<compile_context>
chip_gen: v7x
topology: tpu7x:2x2x1
jax: 0.10.0
libtpu: 0.0.40
codegen_flags: <defaults>
</compile_context>

<pallas_src>
import functools

import jax
import jax.numpy as jnp
from jax.experimental import pallas as pl
from jax.experimental.pallas import tpu as pltpu


# ----------------------------------------------------------------------------
# Model configuration
# ----------------------------------------------------------------------------
IN_DIM = 6
COORDS_DIM = 2
H_DIM = 16            # dim_per_head in Attn
NUM_HEADS = 2
N_LAYERS = 2
OUT_DIM = 4
MLP_OUT_HDIM = 16
BLOCK_SIZE = 8
EMBED = NUM_HEADS * H_DIM   # 32
HALF = H_DIM // 2           # 8
EPS = 1e-5


# ----------------------------------------------------------------------------
# Fused forward kernel (single pallas_call, everything VMEM-resident)
# ----------------------------------------------------------------------------
def _fused_forward_kernel(
    # activations / mask
    x_ref, mask_ref,
    # feat_encoder
    fe1_w_ref, fe1_b_ref, fe2_w_ref, fe2_b_ref,
    # per-layer (stacked along leading L axis)
    n1g_ref, n1b_ref, wqkv_ref, bqkv_ref, mow_ref, mob_ref,
    olw_ref, olb_ref, n2g_ref, n2b_ref,
    ff1w_ref, ff1b_ref, ff2w_ref, ff2b_ref,
    # head
    Ww_ref, mlp1w_ref, mlp1b_ref, lng_ref, lnb_ref,
    mlp2w_ref, mlp2b_ref, opw_ref, opb_ref,
    # output
    out_ref,
    *, n_layers, num_heads, head_dim, eps,
):
    f32 = jnp.float32
    embed = num_heads * head_dim
    scale = 1.0 / float(head_dim) ** 0.5

    def row_layernorm(x, g, b):
        mu = jnp.mean(x, axis=-1, keepdims=True)
        xc = x - mu
        var = jnp.mean(xc * xc, axis=-1, keepdims=True)
        return xc * jax.lax.rsqrt(var + eps) * g + b

    # --- feat_encoder: Linear -> ReLU -> Linear ---
    x = x_ref[...]                                                    # (N, IN)
    h = jnp.dot(x, fe1_w_ref[...], preferred_element_type=f32) + fe1_b_ref[...]
    h = jnp.maximum(h, 0.0)
    h = jnp.dot(h, fe2_w_ref[...], preferred_element_type=f32) + fe2_b_ref[...]

    all_h = [h]
    # --- attention layers (statically unrolled; n_layers == 2) ---
    for l in range(n_layers):
        xn = row_layernorm(h, n1g_ref[l], n1b_ref[l])
        # fused, pre-composed QKV projection: (N, 3*EMBED)
        qkv = jnp.dot(xn, wqkv_ref[l], preferred_element_type=f32) + bqkv_ref[l]
        mow = mow_ref[l]                                              # (E, E)
        o = mob_ref[l]                                                # (1, E)
        for hd in range(num_heads):
            lo = hd * head_dim
            qh = qkv[:, lo:lo + head_dim]
            kh = qkv[:, embed + lo:embed + lo + head_dim]
            vh = qkv[:, 2 * embed + lo:2 * embed + lo + head_dim]
            s = jnp.dot(qh, kh.T, preferred_element_type=f32) * scale
            s = s - jnp.max(s, axis=-1, keepdims=True)
            p = jnp.exp(s)
            p = p * pl.reciprocal(jnp.sum(p, axis=-1, keepdims=True), approx=True)
            attn_hd = jnp.dot(p, vh, preferred_element_type=f32)      # (N, D)
            # fold head concat directly into MHA out_proj (row-block of mow)
            o = o + jnp.dot(attn_hd, mow[lo:lo + head_dim, :],
                            preferred_element_type=f32)
        # Attn.out_linear
        aggr = jnp.dot(o, olw_ref[l], preferred_element_type=f32) + olb_ref[l]
        h = h + aggr                                                  # dropout = identity
        xn2 = row_layernorm(h, n2g_ref[l], n2b_ref[l])
        ff = jnp.dot(xn2, ff1w_ref[l], preferred_element_type=f32) + ff1b_ref[l]
        ff = jnp.maximum(ff, 0.0)
        ff = jnp.dot(ff, ff2w_ref[l], preferred_element_type=f32) + ff2b_ref[l]
        h = h + ff
        all_h.append(h)

    # --- e = tanh(W(cat(all_h)))  (no bias); split W by row-blocks to avoid a
    #     lane concat of the stacked encodings ---
    Ww = Ww_ref[...]                                                  # (H*(L+1), HALF)
    hdim = h.shape[-1]
    e = jnp.dot(all_h[0], Ww[0:hdim, :], preferred_element_type=f32)
    for i in range(1, n_layers + 1):
        e = e + jnp.dot(all_h[i], Ww[i * hdim:(i + 1) * hdim, :],
                        preferred_element_type=f32)
    e = jnp.tanh(e)

    # --- mlp_out: Linear -> graph-LayerNorm -> tanh -> Linear, residual add ---
    m = jnp.dot(e, mlp1w_ref[...], preferred_element_type=f32) + mlp1b_ref[...]
    mc = m - jnp.mean(m)
    std = jnp.sqrt(jnp.mean(mc * mc))
    m = jnp.tanh(mc / (std + eps) * lng_ref[...] + lnb_ref[...])
    m = jnp.dot(m, mlp2w_ref[...], preferred_element_type=f32) + mlp2b_ref[...]
    e = e + m

    # --- out_proj(mean over unpadded tokens) ---
    msk = mask_ref[...]                                               # (N, 1)
    pooled = jnp.sum(e * msk, axis=0, keepdims=True) / jnp.sum(msk)   # (1, HALF)
    out_ref[...] = (jnp.dot(pooled, opw_ref[...], preferred_element_type=f32)
                    + opb_ref[...])


# ----------------------------------------------------------------------------
# Deterministic parameter init (same structure as the PyTorch module)
# ----------------------------------------------------------------------------
def _w(key, shape, scale=0.1):
    return (jax.random.normal(key, shape, jnp.float32) * scale).astype(jnp.float32)


def init_params(key):
    ks = iter(jax.random.split(key, 128))
    p = {}
    p["fe1_w"], p["fe1_b"] = _w(next(ks), (IN_DIM, H_DIM)), jnp.zeros((H_DIM,))
    p["fe2_w"], p["fe2_b"] = _w(next(ks), (H_DIM, H_DIM)), jnp.zeros((H_DIM,))

    layers = []
    for _ in range(N_LAYERS):
        lp = {}
        lp["norm1_g"], lp["norm1_b"] = jnp.ones((H_DIM,)), jnp.zeros((H_DIM,))
        lp["norm2_g"], lp["norm2_b"] = jnp.ones((H_DIM,)), jnp.zeros((H_DIM,))
        lp["wq"] = _w(next(ks), (H_DIM, EMBED))       # no bias
        lp["wk"] = _w(next(ks), (H_DIM, EMBED))
        lp["wv"] = _w(next(ks), (H_DIM, EMBED))
        # nn.MultiheadAttention in-projection (split into q/k/v) + out-projection
        lp["in_wq"], lp["in_bq"] = _w(next(ks), (EMBED, EMBED)), jnp.zeros((EMBED,))
        lp["in_wk"], lp["in_bk"] = _w(next(ks), (EMBED, EMBED)), jnp.zeros((EMBED,))
        lp["in_wv"], lp["in_bv"] = _w(next(ks), (EMBED, EMBED)), jnp.zeros((EMBED,))
        lp["mha_out_w"], lp["mha_out_b"] = _w(next(ks), (EMBED, EMBED)), jnp.zeros((EMBED,))
        lp["out_lin_w"], lp["out_lin_b"] = _w(next(ks), (EMBED, H_DIM)), jnp.zeros((H_DIM,))
        lp["ff1_w"], lp["ff1_b"] = _w(next(ks), (H_DIM, H_DIM)), jnp.zeros((H_DIM,))
        lp["ff2_w"], lp["ff2_b"] = _w(next(ks), (H_DIM, H_DIM)), jnp.zeros((H_DIM,))
        layers.append(lp)
    p["attn_layers"] = layers

    p["W_w"] = _w(next(ks), (H_DIM * (N_LAYERS + 1), HALF))            # no bias
    p["mlp1_w"], p["mlp1_b"] = _w(next(ks), (HALF, MLP_OUT_HDIM)), jnp.zeros((MLP_OUT_HDIM,))
    p["mlp_ln_g"], p["mlp_ln_b"] = jnp.ones((MLP_OUT_HDIM,)), jnp.zeros((MLP_OUT_HDIM,))
    p["mlp2_w"], p["mlp2_b"] = _w(next(ks), (MLP_OUT_HDIM, HALF)), jnp.zeros((HALF,))
    p["out_proj_w"], p["out_proj_b"] = _w(next(ks), (HALF, OUT_DIM)), jnp.zeros((OUT_DIM,))
    return p


def pack_params(p):
    """Compose wq@in_wq (etc.), fuse Q/K/V, stack per-layer params -> flat list
    of arrays in the exact kernel-argument order."""
    layers = p["attn_layers"]

    def stack_vec(name):                       # (L, 1, C)
        return jnp.stack([lp[name] for lp in layers])[:, None, :]

    def stack_mat(name):                       # (L, Cin, Cout)
        return jnp.stack([lp[name] for lp in layers])

    wqkv, bqkv = [], []
    for lp in layers:
        wq = lp["wq"] @ lp["in_wq"]            # (H_DIM, EMBED)
        wk = lp["wk"] @ lp["in_wk"]
        wv = lp["wv"] @ lp["in_wv"]
        wqkv.append(jnp.concatenate([wq, wk, wv], axis=1))                 # (H_DIM, 3E)
        bqkv.append(jnp.concatenate([lp["in_bq"], lp["in_bk"], lp["in_bv"]])[None, :])
    wqkv = jnp.stack(wqkv)                     # (L, H_DIM, 3*EMBED)
    bqkv = jnp.stack(bqkv)                     # (L, 1, 3*EMBED)

    packed = [
        p["fe1_w"], p["fe1_b"][None, :], p["fe2_w"], p["fe2_b"][None, :],
        stack_vec("norm1_g"), stack_vec("norm1_b"),
        wqkv, bqkv,
        stack_mat("mha_out_w"), stack_vec("mha_out_b"),
        stack_mat("out_lin_w"), stack_vec("out_lin_b"),
        stack_vec("norm2_g"), stack_vec("norm2_b"),
        stack_mat("ff1_w"), stack_vec("ff1_b"),
        stack_mat("ff2_w"), stack_vec("ff2_b"),
        p["W_w"],
        p["mlp1_w"], p["mlp1_b"][None, :],
        p["mlp_ln_g"][None, :], p["mlp_ln_b"][None, :],
        p["mlp2_w"], p["mlp2_b"][None, :],
        p["out_proj_w"], p["out_proj_b"][None, :],
    ]
    return packed


# ----------------------------------------------------------------------------
# Forward pass
# ----------------------------------------------------------------------------
def prepare_input(x, coords, batch, block_size):
    # Graph sizes are multiples of block_size -> pad_and_unpad is the identity
    # permutation with an all-True unpad mask (exact for this case).
    # TODO(synk): real region-hash sorting path needs quantile_partition /
    #             get_regions, which are undefined in the reference module.
    del coords, batch, block_size
    n = x.shape[0]
    unpad_seq = jnp.ones((n,), jnp.bool_)
    return x, unpad_seq


def transformer_forward(packed, x, coords, batch):
    x, unpad_seq = prepare_input(x, coords, batch, BLOCK_SIZE)
    n = x.shape[0]
    mask_f = unpad_seq.astype(jnp.float32).reshape(n, 1)

    args = (x, mask_f, *packed)
    vmem = pl.BlockSpec(memory_space=pltpu.MemorySpace.VMEM)
    out = pl.pallas_call(
        functools.partial(
            _fused_forward_kernel,
            n_layers=N_LAYERS, num_heads=NUM_HEADS, head_dim=H_DIM, eps=EPS),
        out_shape=jax.ShapeDtypeStruct((1, OUT_DIM), jnp.float32),
        in_specs=[vmem] * len(args),
        out_specs=vmem,
    )(*args)
    return out[0]


# ----------------------------------------------------------------------------
if __name__ == "__main__":
    key = jax.random.PRNGKey(0)
    k_param, k_x, k_c = jax.random.split(key, 3)

    params = init_params(k_param)
    packed = pack_params(params)   # compose / fuse projection weights once

    # Two graphs of sizes 16 and 8 (both multiples of block_size=8)
    N = 24
    x = jax.random.normal(k_x, (N, IN_DIM), jnp.float32)
    coords = jax.random.normal(k_c, (N, COORDS_DIM), jnp.float32)
    batch = jnp.concatenate([jnp.zeros((16,), jnp.int32), jnp.ones((8,), jnp.int32)])

    fwd = jax.jit(transformer_forward)
    out = fwd(packed, x, coords, batch)
    out = jax.block_until_ready(out)
    assert out.shape == (OUT_DIM,)
    assert bool(jnp.all(jnp.isfinite(out)))
    print("KERNEL_OK")
</pallas_src>

<mosaic_0001>
module attributes {stable_mosaic.version = 11 : i64} {
  func.func @_fused_forward_kernel(%arg0: memref<24x6xf32, #tpu.memory_space<vmem>>, %arg1: memref<24x1xf32, #tpu.memory_space<vmem>>, %arg2: memref<6x16xf32, #tpu.memory_space<vmem>>, %arg3: memref<1x16xf32, #tpu.memory_space<vmem>>, %arg4: memref<16x16xf32, #tpu.memory_space<vmem>>, %arg5: memref<1x16xf32, #tpu.memory_space<vmem>>, %arg6: memref<2x1x16xf32, #tpu.memory_space<vmem>>, %arg7: memref<2x1x16xf32, #tpu.memory_space<vmem>>, %arg8: memref<2x16x96xf32, #tpu.memory_space<vmem>>, %arg9: memref<2x1x96xf32, #tpu.memory_space<vmem>>, %arg10: memref<2x32x32xf32, #tpu.memory_space<vmem>>, %arg11: memref<2x1x32xf32, #tpu.memory_space<vmem>>, %arg12: memref<2x32x16xf32, #tpu.memory_space<vmem>>, %arg13: memref<2x1x16xf32, #tpu.memory_space<vmem>>, %arg14: memref<2x1x16xf32, #tpu.memory_space<vmem>>, %arg15: memref<2x1x16xf32, #tpu.memory_space<vmem>>, %arg16: memref<2x16x16xf32, #tpu.memory_space<vmem>>, %arg17: memref<2x1x16xf32, #tpu.memory_space<vmem>>, %arg18: memref<2x16x16xf32, #tpu.memory_space<vmem>>, %arg19: memref<2x1x16xf32, #tpu.memory_space<vmem>>, %arg20: memref<48x8xf32, #tpu.memory_space<vmem>>, %arg21: memref<8x16xf32, #tpu.memory_space<vmem>>, %arg22: memref<1x16xf32, #tpu.memory_space<vmem>>, %arg23: memref<1x16xf32, #tpu.memory_space<vmem>>, %arg24: memref<1x16xf32, #tpu.memory_space<vmem>>, %arg25: memref<16x8xf32, #tpu.memory_space<vmem>>, %arg26: memref<1x8xf32, #tpu.memory_space<vmem>>, %arg27: memref<8x4xf32, #tpu.memory_space<vmem>>, %arg28: memref<1x4xf32, #tpu.memory_space<vmem>>, %arg29: memref<1x4xf32, #tpu.memory_space<vmem>>) attributes {dimension_semantics = [], scalar_prefetch = 0 : i64, scratch_operands = 0 : i64, tpu.core_type = #tpu.core_type<tc>} {
    %c0 = arith.constant 0 : index
    %c0_0 = arith.constant 0 : index
    %0 = vector.load %arg0[%c0, %c0_0] : memref<24x6xf32, #tpu.memory_space<vmem>>, vector<24x6xf32>
    %c0_1 = arith.constant 0 : index
    %c0_2 = arith.constant 0 : index
    %1 = vector.load %arg2[%c0_1, %c0_2] : memref<6x16xf32, #tpu.memory_space<vmem>>, vector<6x16xf32>
    %cst = arith.constant dense<0.000000e+00> : vector<24x16xf32>
    %2 = tpu.matmul %0, %1, %cst {dimension_numbers = #tpu.dot_dimension_numbers<[1], [0], [0], [1], [0, 0, 1, 1], [], []>} : vector<24x6xf32>, vector<6x16xf32>, vector<24x16xf32> -> vector<24x16xf32>
    %c0_3 = arith.constant 0 : index
    %c0_4 = arith.constant 0 : index
    %3 = vector.load %arg3[%c0_3, %c0_4] : memref<1x16xf32, #tpu.memory_space<vmem>>, vector<1x16xf32>
    %4 = vector.broadcast %3 : vector<1x16xf32> to vector<24x16xf32>
    %5 = arith.addf %2, %4 : vector<24x16xf32>
    %cst_5 = arith.constant 0.000000e+00 : f32
    %6 = vector.broadcast %cst_5 : f32 to vector<24x16xf32>
    %7 = arith.maximumf %5, %6 : vector<24x16xf32>
    %c0_6 = arith.constant 0 : index
    %c0_7 = arith.constant 0 : index
    %8 = vector.load %arg4[%c0_6, %c0_7] : memref<16x16xf32, #tpu.memory_space<vmem>>, vector<16x16xf32>
    %cst_8 = arith.constant dense<0.000000e+00> : vector<24x16xf32>
    %9 = tpu.matmul %7, %8, %cst_8 {dimension_numbers = #tpu.dot_dimension_numbers<[1], [0], [0], [1], [0, 0, 1, 1], [], []>} : vector<24x16xf32>, vector<16x16xf32>, vector<24x16xf32> -> vector<24x16xf32>
    %c0_9 = arith.constant 0 : index
    %c0_10 = arith.constant 0 : index
    %10 = vector.load %arg5[%c0_9, %c0_10] : memref<1x16xf32, #tpu.memory_space<vmem>>, vector<1x16xf32>
    %11 = vector.broadcast %10 : vector<1x16xf32> to vector<24x16xf32>
    %12 = arith.addf %9, %11 : vector<24x16xf32>
    %c0_11 = arith.constant 0 : index
    %c0_12 = arith.constant 0 : index
    %c0_13 = arith.constant 0 : index
    %13 = vector.load %arg6[%c0_11, %c0_12, %c0_13] : memref<2x1x16xf32, #tpu.memory_space<vmem>>, vector<1x1x16xf32>
    %14 = vector.shape_cast %13 : vector<1x1x16xf32> to vector<1x16xf32>
    %c0_14 = arith.constant 0 : index
    %c0_15 = arith.constant 0 : index
    %c0_16 = arith.constant 0 : index
    %15 = vector.load %arg7[%c0_14, %c0_15, %c0_16] : memref<2x1x16xf32, #tpu.memory_space<vmem>>, vector<1x1x16xf32>
    %16 = vector.shape_cast %15 : vector<1x1x16xf32> to vector<1x16xf32>
    %cst_17 = arith.constant dense<0.000000e+00> : vector<24xf32>
    %17 = vector.multi_reduction <add>, %12, %cst_17 [1] : vector<24x16xf32> to vector<24xf32>
    %18 = vector.shape_cast %17 : vector<24xf32> to vector<24x1xf32>
    %cst_18 = arith.constant 1.600000e+01 : f32
    %19 = vector.broadcast %cst_18 : f32 to vector<24x1xf32>
    %20 = arith.divf %18, %19 : vector<24x1xf32>
    %21 = vector.broadcast %20 : vector<24x1xf32> to vector<24x16xf32>
    %22 = arith.subf %12, %21 : vector<24x16xf32>
    %23 = arith.mulf %22, %22 : vector<24x16xf32>
    %cst_19 = arith.constant dense<0.000000e+00> : vector<24xf32>
    %24 = vector.multi_reduction <add>, %23, %cst_19 [1] : vector<24x16xf32> to vector<24xf32>
    %25 = vector.shape_cast %24 : vector<24xf32> to vector<24x1xf32>
    %cst_20 = arith.constant 1.600000e+01 : f32
    %26 = vector.broadcast %cst_20 : f32 to vector<24x1xf32>
    %27 = arith.divf %25, %26 : vector<24x1xf32>
    %cst_21 = arith.constant 9.99999974E-6 : f32
    %28 = vector.broadcast %cst_21 : f32 to vector<24x1xf32>
    %29 = arith.addf %27, %28 : vector<24x1xf32>
    %30 = math.rsqrt %29 : vector<24x1xf32>
    %31 = vector.broadcast %30 : vector<24x1xf32> to vector<24x16xf32>
    %32 = arith.mulf %22, %31 : vector<24x16xf32>
    %33 = vector.broadcast %14 : vector<1x16xf32> to vector<24x16xf32>
    %34 = arith.mulf %32, %33 : vector<24x16xf32>
    %35 = vector.broadcast %16 : vector<1x16xf32> to vector<24x16xf32>
    %36 = arith.addf %34, %35 : vector<24x16xf32>
    %c0_22 = arith.constant 0 : index
    %c0_23 = arith.constant 0 : index
    %c0_24 = arith.constant 0 : index
    %37 = vector.load %arg8[%c0_22, %c0_23, %c0_24] : memref<2x16x96xf32, #tpu.memory_space<vmem>>, vector<1x16x96xf32>
    %38 = vector.shape_cast %37 : vector<1x16x96xf32> to vector<16x96xf32>
    %cst_25 = arith.constant dense<0.000000e+00> : vector<24x96xf32>
    %39 = tpu.matmul %36, %38, %cst_25 {dimension_numbers = #tpu.dot_dimension_numbers<[1], [0], [0], [1], [0, 0, 1, 1], [], []>} : vector<24x16xf32>, vector<16x96xf32>, vector<24x96xf32> -> vector<24x96xf32>
    %c0_26 = arith.constant 0 : index
    %c0_27 = arith.constant 0 : index
    %c0_28 = arith.constant 0 : index
    %40 = vector.load %arg9[%c0_26, %c0_27, %c0_28] : memref<2x1x96xf32, #tpu.memory_space<vmem>>, vector<1x1x96xf32>
    %41 = vector.shape_cast %40 : vector<1x1x96xf32> to vector<1x96xf32>
    %42 = vector.broadcast %41 : vector<1x96xf32> to vector<24x96xf32>
    %43 = arith.addf %39, %42 : vector<24x96xf32>
    %c0_29 = arith.constant 0 : index
    %c0_30 = arith.constant 0 : index
    %c0_31 = arith.constant 0 : index
    %44 = vector.load %arg10[%c0_29, %c0_30, %c0_31] : memref<2x32x32xf32, #tpu.memory_space<vmem>>, vector<1x32x32xf32>
    %45 = vector.shape_cast %44 : vector<1x32x32xf32> to vector<32x32xf32>
    %c0_32 = arith.constant 0 : index
    %c0_33 = arith.constant 0 : index
    %c0_34 = arith.constant 0 : index
    %46 = vector.load %arg11[%c0_32, %c0_33, %c0_34] : memref<2x1x32xf32, #tpu.memory_space<vmem>>, vector<1x1x32xf32>
    %47 = vector.shape_cast %46 : vector<1x1x32xf32> to vector<1x32xf32>
    %48 = vector.extract_strided_slice %43 {offsets = [0, 0], sizes = [24, 16], strides = [1, 1]} : vector<24x96xf32> to vector<24x16xf32>
    %49 = vector.extract_strided_slice %43 {offsets = [0, 32], sizes = [24, 16], strides = [1, 1]} : vector<24x96xf32> to vector<24x16xf32>
    %50 = vector.extract_strided_slice %43 {offsets = [0, 64], sizes = [24, 16], strides = [1, 1]} : vector<24x96xf32> to vector<24x16xf32>
    %51 = tpu.transpose %49, [1, 0] : vector<24x16xf32> -> vector<16x24xf32>
    %cst_35 = arith.constant dense<0.000000e+00> : vector<24x24xf32>
    %52 = tpu.matmul %48, %51, %cst_35 {dimension_numbers = #tpu.dot_dimension_numbers<[1], [0], [0], [1], [0, 0, 1, 1], [], []>} : vector<24x16xf32>, vector<16x24xf32>, vector<24x24xf32> -> vector<24x24xf32>
    %cst_36 = arith.constant 2.500000e-01 : f32
    %53 = vector.broadcast %cst_36 : f32 to vector<24x24xf32>
    %54 = arith.mulf %52, %53 : vector<24x24xf32>
    %cst_37 = arith.constant dense<0xFF800000> : vector<24xf32>
    %55 = vector.multi_reduction <maximumf>, %54, %cst_37 [1] : vector<24x24xf32> to vector<24xf32>
    %56 = vector.shape_cast %55 : vector<24xf32> to vector<24x1xf32>
    %57 = vector.broadcast %56 : vector<24x1xf32> to vector<24x24xf32>
    %58 = arith.subf %54, %57 : vector<24x24xf32>
    %59 = math.exp %58 : vector<24x24xf32>
    %cst_38 = arith.constant dense<0.000000e+00> : vector<24xf32>
    %60 = vector.multi_reduction <add>, %59, %cst_38 [1] : vector<24x24xf32> to vector<24xf32>
    %61 = vector.shape_cast %60 : vector<24xf32> to vector<24x1xf32>
    %62 = tpu.reciprocal %61 {approx = true} : vector<24x1xf32> -> vector<24x1xf32>
    %63 = vector.broadcast %62 : vector<24x1xf32> to vector<24x24xf32>
    %64 = arith.mulf %59, %63 : vector<24x24xf32>
    %cst_39 = arith.constant dense<0.000000e+00> : vector<24x16xf32>
    %65 = tpu.matmul %64, %50, %cst_39 {dimension_numbers = #tpu.dot_dimension_numbers<[1], [0], [0], [1], [0, 0, 1, 1], [], []>} : vector<24x24xf32>, vector<24x16xf32>, vector<24x16xf32> -> vector<24x16xf32>
    %66 = vector.extract_strided_slice %45 {offsets = [0, 0], sizes = [16, 32], strides = [1, 1]} : vector<32x32xf32> to vector<16x32xf32>
    %cst_40 = arith.constant dense<0.000000e+00> : vector<24x32xf32>
    %67 = tpu.matmul %65, %66, %cst_40 {dimension_numbers = #tpu.dot_dimension_numbers<[1], [0], [0], [1], [0, 0, 1, 1], [], []>} : vector<24x16xf32>, vector<16x32xf32>, vector<24x32xf32> -> vector<24x32xf32>
    %68 = vector.broadcast %47 : vector<1x32xf32> to vector<24x32xf32>
    %69 = arith.addf %68, %67 : vector<24x32xf32>
    %70 = vector.extract_strided_slice %43 {offsets = [0, 16], sizes = [24, 16], strides = [1, 1]} : vector<24x96xf32> to vector<24x16xf32>
    %71 = vector.extract_strided_slice %43 {offsets = [0, 48], sizes = [24, 16], strides = [1, 1]} : vector<24x96xf32> to vector<24x16xf32>
    %72 = vector.extract_strided_slice %43 {offsets = [0, 80], sizes = [24, 16], strides = [1, 1]} : vector<24x96xf32> to vector<24x16xf32>
    %73 = tpu.transpose %71, [1, 0] : vector<24x16xf32> -> vector<16x24xf32>
    %cst_41 = arith.constant dense<0.000000e+00> : vector<24x24xf32>
    %74 = tpu.matmul %70, %73, %cst_41 {dimension_numbers = #tpu.dot_dimension_numbers<[1], [0], [0], [1], [0, 0, 1, 1], [], []>} : vector<24x16xf32>, vector<16x24xf32>, vector<24x24xf32> -> vector<24x24xf32>
    %cst_42 = arith.constant 2.500000e-01 : f32
    %75 = vector.broadcast %cst_42 : f32 to vector<24x24xf32>
    %76 = arith.mulf %74, %75 : vector<24x24xf32>
    %cst_43 = arith.constant dense<0xFF800000> : vector<24xf32>
    %77 = vector.multi_reduction <maximumf>, %76, %cst_43 [1] : vector<24x24xf32> to vector<24xf32>
    %78 = vector.shape_cast %77 : vector<24xf32> to vector<24x1xf32>
    %79 = vector.broadcast %78 : vector<24x1xf32> to vector<24x24xf32>
    %80 = arith.subf %76, %79 : vector<24x24xf32>
    %81 = math.exp %80 : vector<24x24xf32>
    %cst_44 = arith.constant dense<0.000000e+00> : vector<24xf32>
    %82 = vector.multi_reduction <add>, %81, %cst_44 [1] : vector<24x24xf32> to vector<24xf32>
    %83 = vector.shape_cast %82 : vector<24xf32> to vector<24x1xf32>
    %84 = tpu.reciprocal %83 {approx = true} : vector<24x1xf32> -> vector<24x1xf32>
    %85 = vector.broadcast %84 : vector<24x1xf32> to vector<24x24xf32>
    %86 = arith.mulf %81, %85 : vector<24x24xf32>
    %cst_45 = arith.constant dense<0.000000e+00> : vector<24x16xf32>
    %87 = tpu.matmul %86, %72, %cst_45 {dimension_numbers = #tpu.dot_dimension_numbers<[1], [0], [0], [1], [0, 0, 1, 1], [], []>} : vector<24x24xf32>, vector<24x16xf32>, vector<24x16xf32> -> vector<24x16xf32>
    %88 = vector.extract_strided_slice %45 {offsets = [16, 0], sizes = [16, 32], strides = [1, 1]} : vector<32x32xf32> to vector<16x32xf32>
    %cst_46 = arith.constant dense<0.000000e+00> : vector<24x32xf32>
    %89 = tpu.matmul %87, %88, %cst_46 {dimension_numbers = #tpu.dot_dimension_numbers<[1], [0], [0], [1], [0, 0, 1, 1], [], []>} : vector<24x16xf32>, vector<16x32xf32>, vector<24x32xf32> -> vector<24x32xf32>
    %90 = arith.addf %69, %89 : vector<24x32xf32>
    %c0_47 = arith.constant 0 : index
    %c0_48 = arith.constant 0 : index
    %c0_49 = arith.constant 0 : index
    %91 = vector.load %arg12[%c0_47, %c0_48, %c0_49] : memref<2x32x16xf32, #tpu.memory_space<vmem>>, vector<1x32x16xf32>
    %92 = vector.shape_cast %91 : vector<1x32x16xf32> to vector<32x16xf32>
    %cst_50 = arith.constant dense<0.000000e+00> : vector<24x16xf32>
    %93 = tpu.matmul %90, %92, %cst_50 {dimension_numbers = #tpu.dot_dimension_numbers<[1], [0], [0], [1], [0, 0, 1, 1], [], []>} : vector<24x32xf32>, vector<32x16xf32>, vector<24x16xf32> -> vector<24x16xf32>
    %c0_51 = arith.constant 0 : index
    %c0_52 = arith.constant 0 : index
    %c0_53 = arith.constant 0 : index
    %94 = vector.load %arg13[%c0_51, %c0_52, %c0_53] : memref<2x1x16xf32, #tpu.memory_space<vmem>>, vector<1x1x16xf32>
    %95 = vector.shape_cast %94 : vector<1x1x16xf32> to vector<1x16xf32>
    %96 = vector.broadcast %95 : vector<1x16xf32> to vector<24x16xf32>
    %97 = arith.addf %93, %96 : vector<24x16xf32>
    %98 = arith.addf %12, %97 : vector<24x16xf32>
    %c0_54 = arith.constant 0 : index
    %c0_55 = arith.constant 0 : index
    %c0_56 = arith.constant 0 : index
    %99 = vector.load %arg14[%c0_54, %c0_55, %c0_56] : memref<2x1x16xf32, #tpu.memory_space<vmem>>, vector<1x1x16xf32>
    %100 = vector.shape_cast %99 : vector<1x1x16xf32> to vector<1x16xf32>
    %c0_57 = arith.constant 0 : index
    %c0_58 = arith.constant 0 : index
    %c0_59 = arith.constant 0 : index
    %101 = vector.load %arg15[%c0_57, %c0_58, %c0_59] : memref<2x1x16xf32, #tpu.memory_space<vmem>>, vector<1x1x16xf32>
    %102 = vector.shape_cast %101 : vector<1x1x16xf32> to vector<1x16xf32>
    %cst_60 = arith.constant dense<0.000000e+00> : vector<24xf32>
    %103 = vector.multi_reduction <add>, %98, %cst_60 [1] : vector<24x16xf32> to vector<24xf32>
    %104 = vector.shape_cast %103 : vector<24xf32> to vector<24x1xf32>
    %cst_61 = arith.constant 1.600000e+01 : f32
    %105 = vector.broadcast %cst_61 : f32 to vector<24x1xf32>
    %106 = arith.divf %104, %105 : vector<24x1xf32>
    %107 = vector.broadcast %106 : vector<24x1xf32> to vector<24x16xf32>
    %108 = arith.subf %98, %107 : vector<24x16xf32>
    %109 = arith.mulf %108, %108 : vector<24x16xf32>
    %cst_62 = arith.constant dense<0.000000e+00> : vector<24xf32>
    %110 = vector.multi_reduction <add>, %109, %cst_62 [1] : vector<24x16xf32> to vector<24xf32>
    %111 = vector.shape_cast %110 : vector<24xf32> to vector<24x1xf32>
    %cst_63 = arith.constant 1.600000e+01 : f32
    %112 = vector.broadcast %cst_63 : f32 to vector<24x1xf32>
    %113 = arith.divf %111, %112 : vector<24x1xf32>
    %cst_64 = arith.constant 9.99999974E-6 : f32
    %114 = vector.broadcast %cst_64 : f32 to vector<24x1xf32>
    %115 = arith.addf %113, %114 : vector<24x1xf32>
    %116 = math.rsqrt %115 : vector<24x1xf32>
    %117 = vector.broadcast %116 : vector<24x1xf32> to vector<24x16xf32>
    %118 = arith.mulf %108, %117 : vector<24x16xf32>
    %119 = vector.broadcast %100 : vector<1x16xf32> to vector<24x16xf32>
    %120 = arith.mulf %118, %119 : vector<24x16xf32>
    %121 = vector.broadcast %102 : vector<1x16xf32> to vector<24x16xf32>
    %122 = arith.addf %120, %121 : vector<24x16xf32>
    %c0_65 = arith.constant 0 : index
    %c0_66 = arith.constant 0 : index
    %c0_67 = arith.constant 0 : index
    %123 = vector.load %arg16[%c0_65, %c0_66, %c0_67] : memref<2x16x16xf32, #tpu.memory_space<vmem>>, vector<1x16x16xf32>
    %124 = vector.shape_cast %123 : vector<1x16x16xf32> to vector<16x16xf32>
    %cst_68 = arith.constant dense<0.000000e+00> : vector<24x16xf32>
    %125 = tpu.matmul %122, %124, %cst_68 {dimension_numbers = #tpu.dot_dimension_numbers<[1], [0], [0], [1], [0, 0, 1, 1], [], []>} : vector<24x16xf32>, vector<16x16xf32>, vector<24x16xf32> -> vector<24x16xf32>
    %c0_69 = arith.constant 0 : index
    %c0_70 = arith.constant 0 : index
    %c0_71 = arith.constant 0 : index
    %126 = vector.load %arg17[%c0_69, %c0_70, %c0_71] : memref<2x1x16xf32, #tpu.memory_space<vmem>>, vector<1x1x16xf32>
    %127 = vector.shape_cast %126 : vector<1x1x16xf32> to vector<1x16xf32>
    %128 = vector.broadcast %127 : vector<1x16xf32> to vector<24x16xf32>
    %129 = arith.addf %125, %128 : vector<24x16xf32>
    %cst_72 = arith.constant 0.000000e+00 : f32
    %130 = vector.broadcast %cst_72 : f32 to vector<24x16xf32>
    %131 = arith.maximumf %129, %130 : vector<24x16xf32>
    %c0_73 = arith.constant 0 : index
    %c0_74 = arith.constant 0 : index
    %c0_75 = arith.constant 0 : index
    %132 = vector.load %arg18[%c0_73, %c0_74, %c0_75] : memref<2x16x16xf32, #tpu.memory_space<vmem>>, vector<1x16x16xf32>
    %133 = vector.shape_cast %132 : vector<1x16x16xf32> to vector<16x16xf32>
    %cst_76 = arith.constant dense<0.000000e+00> : vector<24x16xf32>
    %134 = tpu.matmul %131, %133, %cst_76 {dimension_numbers = #tpu.dot_dimension_numbers<[1], [0], [0], [1], [0, 0, 1, 1], [], []>} : vector<24x16xf32>, vector<16x16xf32>, vector<24x16xf32> -> vector<24x16xf32>
    %c0_77 = arith.constant 0 : index
    %c0_78 = arith.constant 0 : index
    %c0_79 = arith.constant 0 : index
    %135 = vector.load %arg19[%c0_77, %c0_78, %c0_79] : memref<2x1x16xf32, #tpu.memory_space<vmem>>, vector<1x1x16xf32>
    %136 = vector.shape_cast %135 : vector<1x1x16xf32> to vector<1x16xf32>
    %137 = vector.broadcast %136 : vector<1x16xf32> to vector<24x16xf32>
    %138 = arith.addf %134, %137 : vector<24x16xf32>
    %139 = arith.addf %98, %138 : vector<24x16xf32>
    %c1 = arith.constant 1 : index
    %c0_80 = arith.constant 0 : index
    %c0_81 = arith.constant 0 : index
    %140 = vector.load %arg6[%c1, %c0_80, %c0_81] : memref<2x1x16xf32, #tpu.memory_space<vmem>>, vector<1x1x16xf32>
    %141 = vector.shape_cast %140 : vector<1x1x16xf32> to vector<1x16xf32>
    %c1_82 = arith.constant 1 : index
    %c0_83 = arith.constant 0 : index
    %c0_84 = arith.constant 0 : index
    %142 = vector.load %arg7[%c1_82, %c0_83, %c0_84] : memref<2x1x16xf32, #tpu.memory_space<vmem>>, vector<1x1x16xf32>
    %143 = vector.shape_cast %142 : vector<1x1x16xf32> to vector<1x16xf32>
    %cst_85 = arith.constant dense<0.000000e+00> : vector<24xf32>
    %144 = vector.multi_reduction <add>, %139, %cst_85 [1] : vector<24x16xf32> to vector<24xf32>
    %145 = vector.shape_cast %144 : vector<24xf32> to vector<24x1xf32>
    %cst_86 = arith.constant 1.600000e+01 : f32
    %146 = vector.broadcast %cst_86 : f32 to vector<24x1xf32>
    %147 = arith.divf %145, %146 : vector<24x1xf32>
    %148 = vector.broadcast %147 : vector<24x1xf32> to vector<24x16xf32>
    %149 = arith.subf %139, %148 : vector<24x16xf32>
    %150 = arith.mulf %149, %149 : vector<24x16xf32>
    %cst_87 = arith.constant dense<0.000000e+00> : vector<24xf32>
    %151 = vector.multi_reduction <add>, %150, %cst_87 [1] : vector<24x16xf32> to vector<24xf32>
    %152 = vector.shape_cast %151 : vector<24xf32> to vector<24x1xf32>
    %cst_88 = arith.constant 1.600000e+01 : f32
    %153 = vector.broadcast %cst_88 : f32 to vector<24x1xf32>
    %154 = arith.divf %152, %153 : vector<24x1xf32>
    %cst_89 = arith.constant 9.99999974E-6 : f32
    %155 = vector.broadcast %cst_89 : f32 to vector<24x1xf32>
    %156 = arith.addf %154, %155 : vector<24x1xf32>
    %157 = math.rsqrt %156 : vector<24x1xf32>
    %158 = vector.broadcast %157 : vector<24x1xf32> to vector<24x16xf32>
    %159 = arith.mulf %149, %158 : vector<24x16xf32>
    %160 = vector.broadcast %141 : vector<1x16xf32> to vector<24x16xf32>
    %161 = arith.mulf %159, %160 : vector<24x16xf32>
    %162 = vector.broadcast %143 : vector<1x16xf32> to vector<24x16xf32>
    %163 = arith.addf %161, %162 : vector<24x16xf32>
    %c1_90 = arith.constant 1 : index
    %c0_91 = arith.constant 0 : index
    %c0_92 = arith.constant 0 : index
    %164 = vector.load %arg8[%c1_90, %c0_91, %c0_92] : memref<2x16x96xf32, #tpu.memory_space<vmem>>, vector<1x16x96xf32>
    %165 = vector.shape_cast %164 : vector<1x16x96xf32> to vector<16x96xf32>
    %cst_93 = arith.constant dense<0.000000e+00> : vector<24x96xf32>
    %166 = tpu.matmul %163, %165, %cst_93 {dimension_numbers = #tpu.dot_dimension_numbers<[1], [0], [0], [1], [0, 0, 1, 1], [], []>} : vector<24x16xf32>, vector<16x96xf32>, vector<24x96xf32> -> vector<24x96xf32>
    %c1_94 = arith.constant 1 : index
    %c0_95 = arith.constant 0 : index
    %c0_96 = arith.constant 0 : index
    %167 = vector.load %arg9[%c1_94, %c0_95, %c0_96] : memref<2x1x96xf32, #tpu.memory_space<vmem>>, vector<1x1x96xf32>
    %168 = vector.shape_cast %167 : vector<1x1x96xf32> to vector<1x96xf32>
    %169 = vector.broadcast %168 : vector<1x96xf32> to vector<24x96xf32>
    %170 = arith.addf %166, %169 : vector<24x96xf32>
    %c1_97 = arith.constant 1 : index
    %c0_98 = arith.constant 0 : index
    %c0_99 = arith.constant 0 : index
    %171 = vector.load %arg10[%c1_97, %c0_98, %c0_99] : memref<2x32x32xf32, #tpu.memory_space<vmem>>, vector<1x32x32xf32>
    %172 = vector.shape_cast %171 : vector<1x32x32xf32> to vector<32x32xf32>
    %c1_100 = arith.constant 1 : index
    %c0_101 = arith.constant 0 : index
    %c0_102 = arith.constant 0 : index
    %173 = vector.load %arg11[%c1_100, %c0_101, %c0_102] : memref<2x1x32xf32, #tpu.memory_space<vmem>>, vector<1x1x32xf32>
    %174 = vector.shape_cast %173 : vector<1x1x32xf32> to vector<1x32xf32>
    %175 = vector.extract_strided_slice %170 {offsets = [0, 0], sizes = [24, 16], strides = [1, 1]} : vector<24x96xf32> to vector<24x16xf32>
    %176 = vector.extract_strided_slice %170 {offsets = [0, 32], sizes = [24, 16], strides = [1, 1]} : vector<24x96xf32> to vector<24x16xf32>
    %177 = vector.extract_strided_slice %170 {offsets = [0, 64], sizes = [24, 16], strides = [1, 1]} : vector<24x96xf32> to vector<24x16xf32>
    %178 = tpu.transpose %176, [1, 0] : vector<24x16xf32> -> vector<16x24xf32>
    %cst_103 = arith.constant dense<0.000000e+00> : vector<24x24xf32>
    %179 = tpu.matmul %175, %178, %cst_103 {dimension_numbers = #tpu.dot_dimension_numbers<[1], [0], [0], [1], [0, 0, 1, 1], [], []>} : vector<24x16xf32>, vector<16x24xf32>, vector<24x24xf32> -> vector<24x24xf32>
    %cst_104 = arith.constant 2.500000e-01 : f32
    %180 = vector.broadcast %cst_104 : f32 to vector<24x24xf32>
    %181 = arith.mulf %179, %180 : vector<24x24xf32>
    %cst_105 = arith.constant dense<0xFF800000> : vector<24xf32>
    %182 = vector.multi_reduction <maximumf>, %181, %cst_105 [1] : vector<24x24xf32> to vector<24xf32>
    %183 = vector.shape_cast %182 : vector<24xf32> to vector<24x1xf32>
    %184 = vector.broadcast %183 : vector<24x1xf32> to vector<24x24xf32>
    %185 = arith.subf %181, %184 : vector<24x24xf32>
    %186 = math.exp %185 : vector<24x24xf32>
    %cst_106 = arith.constant dense<0.000000e+00> : vector<24xf32>
    %187 = vector.multi_reduction <add>, %186, %cst_106 [1] : vector<24x24xf32> to vector<24xf32>
    %188 = vector.shape_cast %187 : vector<24xf32> to vector<24x1xf32>
    %189 = tpu.reciprocal %188 {approx = true} : vector<24x1xf32> -> vector<24x1xf32>
    %190 = vector.broadcast %189 : vector<24x1xf32> to vector<24x24xf32>
    %191 = arith.mulf %186, %190 : vector<24x24xf32>
    %cst_107 = arith.constant dense<0.000000e+00> : vector<24x16xf32>
    %192 = tpu.matmul %191, %177, %cst_107 {dimension_numbers = #tpu.dot_dimension_numbers<[1], [0], [0], [1], [0, 0, 1, 1], [], []>} : vector<24x24xf32>, vector<24x16xf32>, vector<24x16xf32> -> vector<24x16xf32>
    %193 = vector.extract_strided_slice %172 {offsets = [0, 0], sizes = [16, 32], strides = [1, 1]} : vector<32x32xf32> to vector<16x32xf32>
    %cst_108 = arith.constant dense<0.000000e+00> : vector<24x32xf32>
    %194 = tpu.matmul %192, %193, %cst_108 {dimension_numbers = #tpu.dot_dimension_numbers<[1], [0], [0], [1], [0, 0, 1, 1], [], []>} : vector<24x16xf32>, vector<16x32xf32>, vector<24x32xf32> -> vector<24x32xf32>
    %195 = vector.broadcast %174 : vector<1x32xf32> to vector<24x32xf32>
    %196 = arith.addf %195, %194 : vector<24x32xf32>
    %197 = vector.extract_strided_slice %170 {offsets = [0, 16], sizes = [24, 16], strides = [1, 1]} : vector<24x96xf32> to vector<24x16xf32>
    %198 = vector.extract_strided_slice %170 {offsets = [0, 48], sizes = [24, 16], strides = [1, 1]} : vector<24x96xf32> to vector<24x16xf32>
    %199 = vector.extract_strided_slice %170 {offsets = [0, 80], sizes = [24, 16], strides = [1, 1]} : vector<24x96xf32> to vector<24x16xf32>
    %200 = tpu.transpose %198, [1, 0] : vector<24x16xf32> -> vector<16x24xf32>
    %cst_109 = arith.constant dense<0.000000e+00> : vector<24x24xf32>
    %201 = tpu.matmul %197, %200, %cst_109 {dimension_numbers = #tpu.dot_dimension_numbers<[1], [0], [0], [1], [0, 0, 1, 1], [], []>} : vector<24x16xf32>, vector<16x24xf32>, vector<24x24xf32> -> vector<24x24xf32>
    %cst_110 = arith.constant 2.500000e-01 : f32
    %202 = vector.broadcast %cst_110 : f32 to vector<24x24xf32>
    %203 = arith.mulf %201, %202 : vector<24x24xf32>
    %cst_111 = arith.constant dense<0xFF800000> : vector<24xf32>
    %204 = vector.multi_reduction <maximumf>, %203, %cst_111 [1] : vector<24x24xf32> to vector<24xf32>
    %205 = vector.shape_cast %204 : vector<24xf32> to vector<24x1xf32>
    %206 = vector.broadcast %205 : vector<24x1xf32> to vector<24x24xf32>
    %207 = arith.subf %203, %206 : vector<24x24xf32>
    %208 = math.exp %207 : vector<24x24xf32>
    %cst_112 = arith.constant dense<0.000000e+00> : vector<24xf32>
    %209 = vector.multi_reduction <add>, %208, %cst_112 [1] : vector<24x24xf32> to vector<24xf32>
    %210 = vector.shape_cast %209 : vector<24xf32> to vector<24x1xf32>
    %211 = tpu.reciprocal %210 {approx = true} : vector<24x1xf32> -> vector<24x1xf32>
    %212 = vector.broadcast %211 : vector<24x1xf32> to vector<24x24xf32>
    %213 = arith.mulf %208, %212 : vector<24x24xf32>
    %cst_113 = arith.constant dense<0.000000e+00> : vector<24x16xf32>
    %214 = tpu.matmul %213, %199, %cst_113 {dimension_numbers = #tpu.dot_dimension_numbers<[1], [0], [0], [1], [0, 0, 1, 1], [], []>} : vector<24x24xf32>, vector<24x16xf32>, vector<24x16xf32> -> vector<24x16xf32>
    %215 = vector.extract_strided_slice %172 {offsets = [16, 0], sizes = [16, 32], strides = [1, 1]} : vector<32x32xf32> to vector<16x32xf32>
    %cst_114 = arith.constant dense<0.000000e+00> : vector<24x32xf32>
    %216 = tpu.matmul %214, %215, %cst_114 {dimension_numbers = #tpu.dot_dimension_numbers<[1], [0], [0], [1], [0, 0, 1, 1], [], []>} : vector<24x16xf32>, vector<16x32xf32>, vector<24x32xf32> -> vector<24x32xf32>
    %217 = arith.addf %196, %216 : vector<24x32xf32>
    %c1_115 = arith.constant 1 : index
    %c0_116 = arith.constant 0 : index
    %c0_117 = arith.constant 0 : index
    %218 = vector.load %arg12[%c1_115, %c0_116, %c0_117] : memref<2x32x16xf32, #tpu.memory_space<vmem>>, vector<1x32x16xf32>
    %219 = vector.shape_cast %218 : vector<1x32x16xf32> to vector<32x16xf32>
    %cst_118 = arith.constant dense<0.000000e+00> : vector<24x16xf32>
    %220 = tpu.matmul %217, %219, %cst_118 {dimension_numbers = #tpu.dot_dimension_numbers<[1], [0], [0], [1], [0, 0, 1, 1], [], []>} : vector<24x32xf32>, vector<32x16xf32>, vector<24x16xf32> -> vector<24x16xf32>
    %c1_119 = arith.constant 1 : index
    %c0_120 = arith.constant 0 : index
    %c0_121 = arith.constant 0 : index
    %221 = vector.load %arg13[%c1_119, %c0_120, %c0_121] : memref<2x1x16xf32, #tpu.memory_space<vmem>>, vector<1x1x16xf32>
    %222 = vector.shape_cast %221 : vector<1x1x16xf32> to vector<1x16xf32>
    %223 = vector.broadcast %222 : vector<1x16xf32> to vector<24x16xf32>
    %224 = arith.addf %220, %223 : vector<24x16xf32>
    %225 = arith.addf %139, %224 : vector<24x16xf32>
    %c1_122 = arith.constant 1 : index
    %c0_123 = arith.constant 0 : index
    %c0_124 = arith.constant 0 : index
    %226 = vector.load %arg14[%c1_122, %c0_123, %c0_124] : memref<2x1x16xf32, #tpu.memory_space<vmem>>, vector<1x1x16xf32>
    %227 = vector.shape_cast %226 : vector<1x1x16xf32> to vector<1x16xf32>
    %c1_125 = arith.constant 1 : index
    %c0_126 = arith.constant 0 : index
    %c0_127 = arith.constant 0 : index
    %228 = vector.load %arg15[%c1_125, %c0_126, %c0_127] : memref<2x1x16xf32, #tpu.memory_space<vmem>>, vector<1x1x16xf32>
    %229 = vector.shape_cast %228 : vector<1x1x16xf32> to vector<1x16xf32>
    %cst_128 = arith.constant dense<0.000000e+00> : vector<24xf32>
    %230 = vector.multi_reduction <add>, %225, %cst_128 [1] : vector<24x16xf32> to vector<24xf32>
    %231 = vector.shape_cast %230 : vector<24xf32> to vector<24x1xf32>
    %cst_129 = arith.constant 1.600000e+01 : f32
    %232 = vector.broadcast %cst_129 : f32 to vector<24x1xf32>
    %233 = arith.divf %231, %232 : vector<24x1xf32>
    %234 = vector.broadcast %233 : vector<24x1xf32> to vector<24x16xf32>
    %235 = arith.subf %225, %234 : vector<24x16xf32>
    %236 = arith.mulf %235, %235 : vector<24x16xf32>
    %cst_130 = arith.constant dense<0.000000e+00> : vector<24xf32>
    %237 = vector.multi_reduction <add>, %236, %cst_130 [1] : vector<24x16xf32> to vector<24xf32>
    %238 = vector.shape_cast %237 : vector<24xf32> to vector<24x1xf32>
    %cst_131 = arith.constant 1.600000e+01 : f32
    %239 = vector.broadcast %cst_131 : f32 to vector<24x1xf32>
    %240 = arith.divf %238, %239 : vector<24x1xf32>
    %cst_132 = arith.constant 9.99999974E-6 : f32
    %241 = vector.broadcast %cst_132 : f32 to vector<24x1xf32>
    %242 = arith.addf %240, %241 : vector<24x1xf32>
    %243 = math.rsqrt %242 : vector<24x1xf32>
    %244 = vector.broadcast %243 : vector<24x1xf32> to vector<24x16xf32>
    %245 = arith.mulf %235, %244 : vector<24x16xf32>
    %246 = vector.broadcast %227 : vector<1x16xf32> to vector<24x16xf32>
    %247 = arith.mulf %245, %246 : vector<24x16xf32>
    %248 = vector.broadcast %229 : vector<1x16xf32> to vector<24x16xf32>
    %249 = arith.addf %247, %248 : vector<24x16xf32>
    %c1_133 = arith.constant 1 : index
    %c0_134 = arith.constant 0 : index
    %c0_135 = arith.constant 0 : index
    %250 = vector.load %arg16[%c1_133, %c0_134, %c0_135] : memref<2x16x16xf32, #tpu.memory_space<vmem>>, vector<1x16x16xf32>
    %251 = vector.shape_cast %250 : vector<1x16x16xf32> to vector<16x16xf32>
    %cst_136 = arith.constant dense<0.000000e+00> : vector<24x16xf32>
    %252 = tpu.matmul %249, %251, %cst_136 {dimension_numbers = #tpu.dot_dimension_numbers<[1], [0], [0], [1], [0, 0, 1, 1], [], []>} : vector<24x16xf32>, vector<16x16xf32>, vector<24x16xf32> -> vector<24x16xf32>
    %c1_137 = arith.constant 1 : index
    %c0_138 = arith.constant 0 : index
    %c0_139 = arith.constant 0 : index
    %253 = vector.load %arg17[%c1_137, %c0_138, %c0_139] : memref<2x1x16xf32, #tpu.memory_space<vmem>>, vector<1x1x16xf32>
    %254 = vector.shape_cast %253 : vector<1x1x16xf32> to vector<1x16xf32>
    %255 = vector.broadcast %254 : vector<1x16xf32> to vector<24x16xf32>
    %256 = arith.addf %252, %255 : vector<24x16xf32>
    %cst_140 = arith.constant 0.000000e+00 : f32
    %257 = vector.broadcast %cst_140 : f32 to vector<24x16xf32>
    %258 = arith.maximumf %256, %257 : vector<24x16xf32>
    %c1_141 = arith.constant 1 : index
    %c0_142 = arith.constant 0 : index
    %c0_143 = arith.constant 0 : index
    %259 = vector.load %arg18[%c1_141, %c0_142, %c0_143] : memref<2x16x16xf32, #tpu.memory_space<vmem>>, vector<1x16x16xf32>
    %260 = vector.shape_cast %259 : vector<1x16x16xf32> to vector<16x16xf32>
    %cst_144 = arith.constant dense<0.000000e+00> : vector<24x16xf32>
    %261 = tpu.matmul %258, %260, %cst_144 {dimension_numbers = #tpu.dot_dimension_numbers<[1], [0], [0], [1], [0, 0, 1, 1], [], []>} : vector<24x16xf32>, vector<16x16xf32>, vector<24x16xf32> -> vector<24x16xf32>
    %c1_145 = arith.constant 1 : index
    %c0_146 = arith.constant 0 : index
    %c0_147 = arith.constant 0 : index
    %262 = vector.load %arg19[%c1_145, %c0_146, %c0_147] : memref<2x1x16xf32, #tpu.memory_space<vmem>>, vector<1x1x16xf32>
    %263 = vector.shape_cast %262 : vector<1x1x16xf32> to vector<1x16xf32>
    %264 = vector.broadcast %263 : vector<1x16xf32> to vector<24x16xf32>
    %265 = arith.addf %261, %264 : vector<24x16xf32>
    %266 = arith.addf %225, %265 : vector<24x16xf32>
    %c0_148 = arith.constant 0 : index
    %c0_149 = arith.constant 0 : index
    %267 = vector.load %arg20[%c0_148, %c0_149] : memref<48x8xf32, #tpu.memory_space<vmem>>, vector<48x8xf32>
    %268 = vector.extract_strided_slice %267 {offsets = [0, 0], sizes = [16, 8], strides = [1, 1]} : vector<48x8xf32> to vector<16x8xf32>
    %cst_150 = arith.constant dense<0.000000e+00> : vector<24x8xf32>
    %269 = tpu.matmul %12, %268, %cst_150 {dimension_numbers = #tpu.dot_dimension_numbers<[1], [0], [0], [1], [0, 0, 1, 1], [], []>} : vector<24x16xf32>, vector<16x8xf32>, vector<24x8xf32> -> vector<24x8xf32>
    %270 = vector.extract_strided_slice %267 {offsets = [16, 0], sizes = [16, 8], strides = [1, 1]} : vector<48x8xf32> to vector<16x8xf32>
    %cst_151 = arith.constant dense<0.000000e+00> : vector<24x8xf32>
    %271 = tpu.matmul %139, %270, %cst_151 {dimension_numbers = #tpu.dot_dimension_numbers<[1], [0], [0], [1], [0, 0, 1, 1], [], []>} : vector<24x16xf32>, vector<16x8xf32>, vector<24x8xf32> -> vector<24x8xf32>
    %272 = arith.addf %269, %271 : vector<24x8xf32>
    %273 = vector.extract_strided_slice %267 {offsets = [32, 0], sizes = [16, 8], strides = [1, 1]} : vector<48x8xf32> to vector<16x8xf32>
    %cst_152 = arith.constant dense<0.000000e+00> : vector<24x8xf32>
    %274 = tpu.matmul %266, %273, %cst_152 {dimension_numbers = #tpu.dot_dimension_numbers<[1], [0], [0], [1], [0, 0, 1, 1], [], []>} : vector<24x16xf32>, vector<16x8xf32>, vector<24x8xf32> -> vector<24x8xf32>
    %275 = arith.addf %272, %274 : vector<24x8xf32>
    %276 = math.tanh %275 : vector<24x8xf32>
    %c0_153 = arith.constant 0 : index
    %c0_154 = arith.constant 0 : index
    %277 = vector.load %arg21[%c0_153, %c0_154] : memref<8x16xf32, #tpu.memory_space<vmem>>, vector<8x16xf32>
    %cst_155 = arith.constant dense<0.000000e+00> : vector<24x16xf32>
    %278 = tpu.matmul %276, %277, %cst_155 {dimension_numbers = #tpu.dot_dimension_numbers<[1], [0], [0], [1], [0, 0, 1, 1], [], []>} : vector<24x8xf32>, vector<8x16xf32>, vector<24x16xf32> -> vector<24x16xf32>
    %c0_156 = arith.constant 0 : index
    %c0_157 = arith.constant 0 : index
    %279 = vector.load %arg22[%c0_156, %c0_157] : memref<1x16xf32, #tpu.memory_space<vmem>>, vector<1x16xf32>
    %280 = vector.broadcast %279 : vector<1x16xf32> to vector<24x16xf32>
    %281 = arith.addf %278, %280 : vector<24x16xf32>
    %282 = vector.shape_cast %281 : vector<24x16xf32> to vector<1x24x16xf32>
    %cst_158 = arith.constant dense<0.000000e+00> : vector<1xf32>
    %283 = vector.multi_reduction <add>, %282, %cst_158 [1, 2] : vector<1x24x16xf32> to vector<1xf32>
    %284 = vector.shape_cast %283 : vector<1xf32> to vector<1x1x1xf32>
    %285 = vector.extract %284[0, 0, 0] : f32 from vector<1x1x1xf32>
    %cst_159 = arith.constant 3.840000e+02 : f32
    %286 = arith.divf %285, %cst_159 : f32
    %287 = vector.broadcast %286 : f32 to vector<24x16xf32>
    %288 = arith.subf %281, %287 : vector<24x16xf32>
    %289 = arith.mulf %288, %288 : vector<24x16xf32>
    %290 = vector.shape_cast %289 : vector<24x16xf32> to vector<1x24x16xf32>
    %cst_160 = arith.constant dense<0.000000e+00> : vector<1xf32>
    %291 = vector.multi_reduction <add>, %290, %cst_160 [1, 2] : vector<1x24x16xf32> to vector<1xf32>
    %292 = vector.shape_cast %291 : vector<1xf32> to vector<1x1x1xf32>
    %293 = vector.extract %292[0, 0, 0] : f32 from vector<1x1x1xf32>
    %cst_161 = arith.constant 3.840000e+02 : f32
    %294 = arith.divf %293, %cst_161 : f32
    %295 = math.sqrt %294 : f32
    %cst_162 = arith.constant 9.99999974E-6 : f32
    %296 = arith.addf %295, %cst_162 : f32
    %297 = vector.broadcast %296 : f32 to vector<24x16xf32>
    %298 = arith.divf %288, %297 : vector<24x16xf32>
    %c0_163 = arith.constant 0 : index
    %c0_164 = arith.constant 0 : index
    %299 = vector.load %arg23[%c0_163, %c0_164] : memref<1x16xf32, #tpu.memory_space<vmem>>, vector<1x16xf32>
    %300 = vector.broadcast %299 : vector<1x16xf32> to vector<24x16xf32>
    %301 = arith.mulf %298, %300 : vector<24x16xf32>
    %c0_165 = arith.constant 0 : index
    %c0_166 = arith.constant 0 : index
    %302 = vector.load %arg24[%c0_165, %c0_166] : memref<1x16xf32, #tpu.memory_space<vmem>>, vector<1x16xf32>
    %303 = vector.broadcast %302 : vector<1x16xf32> to vector<24x16xf32>
    %304 = arith.addf %301, %303 : vector<24x16xf32>
    %305 = math.tanh %304 : vector<24x16xf32>
    %c0_167 = arith.constant 0 : index
    %c0_168 = arith.constant 0 : index
    %306 = vector.load %arg25[%c0_167, %c0_168] : memref<16x8xf32, #tpu.memory_space<vmem>>, vector<16x8xf32>
    %cst_169 = arith.constant dense<0.000000e+00> : vector<24x8xf32>
    %307 = tpu.matmul %305, %306, %cst_169 {dimension_numbers = #tpu.dot_dimension_numbers<[1], [0], [0], [1], [0, 0, 1, 1], [], []>} : vector<24x16xf32>, vector<16x8xf32>, vector<24x8xf32> -> vector<24x8xf32>
    %c0_170 = arith.constant 0 : index
    %c0_171 = arith.constant 0 : index
    %308 = vector.load %arg26[%c0_170, %c0_171] : memref<1x8xf32, #tpu.memory_space<vmem>>, vector<1x8xf32>
    %309 = vector.broadcast %308 : vector<1x8xf32> to vector<24x8xf32>
    %310 = arith.addf %307, %309 : vector<24x8xf32>
    %311 = arith.addf %276, %310 : vector<24x8xf32>
    %c0_172 = arith.constant 0 : index
    %c0_173 = arith.constant 0 : index
    %312 = vector.load %arg1[%c0_172, %c0_173] : memref<24x1xf32, #tpu.memory_space<vmem>>, vector<24x1xf32>
    %313 = vector.broadcast %312 : vector<24x1xf32> to vector<24x8xf32>
    %314 = arith.mulf %311, %313 : vector<24x8xf32>
    %cst_174 = arith.constant dense<0.000000e+00> : vector<8xf32>
    %315 = vector.multi_reduction <add>, %314, %cst_174 [0] : vector<24x8xf32> to vector<8xf32>
    %316 = vector.shape_cast %315 : vector<8xf32> to vector<1x8xf32>
    %317 = vector.shape_cast %312 : vector<24x1xf32> to vector<1x24x1xf32>
    %cst_175 = arith.constant dense<0.000000e+00> : vector<1xf32>
    %318 = vector.multi_reduction <add>, %317, %cst_175 [1, 2] : vector<1x24x1xf32> to vector<1xf32>
    %319 = vector.shape_cast %318 : vector<1xf32> to vector<1x1x1xf32>
    %320 = vector.extract %319[0, 0, 0] : f32 from vector<1x1x1xf32>
    %321 = vector.broadcast %320 : f32 to vector<1x8xf32>
    %322 = arith.divf %316, %321 : vector<1x8xf32>
    %c0_176 = arith.constant 0 : index
    %c0_177 = arith.constant 0 : index
    %323 = vector.load %arg27[%c0_176, %c0_177] : memref<8x4xf32, #tpu.memory_space<vmem>>, vector<8x4xf32>
    %cst_178 = arith.constant dense<0.000000e+00> : vector<1x4xf32>
    %324 = tpu.matmul %322, %323, %cst_178 {dimension_numbers = #tpu.dot_dimension_numbers<[1], [0], [0], [1], [0, 0, 1, 1], [], []>} : vector<1x8xf32>, vector<8x4xf32>, vector<1x4xf32> -> vector<1x4xf32>
    %c0_179 = arith.constant 0 : index
    %c0_180 = arith.constant 0 : index
    %325 = vector.load %arg28[%c0_179, %c0_180] : memref<1x4xf32, #tpu.memory_space<vmem>>, vector<1x4xf32>
    %326 = arith.addf %324, %325 : vector<1x4xf32>
    %c0_181 = arith.constant 0 : index
    %c0_182 = arith.constant 0 : index
    %327 = vector.load %arg29[%c0_181, %c0_182] : memref<1x4xf32, #tpu.memory_space<vmem>>, vector<1x4xf32>
    tpu.vector_store %arg29[%c0_181, %c0_182], %326 {strides = array<i32>} : memref<1x4xf32, #tpu.memory_space<vmem>>, vector<1x4xf32>,
    return
  }
}

</mosaic_0001>

<bundles_post_ra>
// kernel: transformer_forward.1
= control target key start
LH: loop header
LB: loop body
LE: loop exit
PB: predicated region body
PF: predicated region fallthrough
CT: control target
= control target key end

     0   :  { %s4513_s6 = smov 1   ;;  %s4514_s10 = smov 2   ;;  %s5291_s0 = inlined_call_operand.smem [shape: u32[30], index: -1, kind: input, shape index: {}] }
   0x1   :  { %s4562_s5 = sld [smem:[%s5291_s0]]   ;;  %s4515_s14 = smov 3  }
   0x2   :  { %s4567_s9 = sld [smem:[%s5291_s0 + %s4513_s6]]   ;;  %s4516_s18 = smov 4  }
   0x3   :  { %s4572_s13 = sld [smem:[%s5291_s0 + %s4514_s10]]   ;;  %s4517_s22 = smov 5  }
   0x4   :  { %s4577_s17 = sld [smem:[%s5291_s0 + %s4515_s14]]   ;;  %s4518_s26 = smov 6  }
   0x5   :  { %s4582_s21 = sld [smem:[%s5291_s0 + %s4516_s18]]   ;;  %s4519_s30 = smov 7  }
   0x6   :  { %s4587_s25 = sld [smem:[%s5291_s0 + %s4517_s22]]   ;;  %s4520_s4 = smov 8  }
   0x7   :  { %s4592_s29 = sld [smem:[%s5291_s0 + %s4518_s26]]   ;;  %s4521_s10 = smov 9  }
   0x8   :  { %5300 = sst [smem:[#allocation11_spill]] %s4567_s9  ;;  %s4522_s15 = smov 10  }
   0x9   :  { %s4597_s3 = sld [smem:[%s5291_s0 + %s4519_s30]]   ;;  %s4523_s20 = smov 11  }
   0xa   :  { %s4602_s8 = sld [smem:[%s5291_s0 + %s4520_s4]]   ;;  %s4524_s26 = smov 12  }
   0xb   :  { %s4607_s14 = sld [smem:[%s5291_s0 + %s4521_s10]]   ;;  %s4525_s1 = smov 13  }
   0xc   :  { %s4612_s19 = sld [smem:[%s5291_s0 + %s4522_s15]]   ;;  %s4526_s7 = smov 14  }
   0xd   :  { %s4617_s24 = sld [smem:[%s5291_s0 + %s4523_s20]]   ;;  %s4527_s15 = smov 15  }
   0xe   :  { %s4622_s30 = sld [smem:[%s5291_s0 + %s4524_s26]]   ;;  %s4528_s22 = smov 16  }
   0xf   :  { %s4627_s6 = sld [smem:[%s5291_s0 + %s4525_s1]]   ;;  %s4529_s28 = smov 17  }
  0x10   :  { %s4632_s12 = sld [smem:[%s5291_s0 + %s4526_s7]]   ;;  %s4530_s7 = smov 18  }
  0x11   :  { %s4637_s20 = sld [smem:[%s5291_s0 + %s4527_s15]]   ;;  %s4531_s15 = smov 19  }
  0x12   :  { %s4642_s27 = sld [smem:[%s5291_s0 + %s4528_s22]]   ;;  %s4532_s22 = smov 20  }
  0x13   :  { %s4647_s4 = sld [smem:[%s5291_s0 + %s4529_s28]]   ;;  %s4533_s28 = smov 21  }
  0x14   :  { %s4652_s9 = sld [smem:[%s5291_s0 + %s4530_s7]]   ;;  %s4534_s7 = smov 22  }
  0x16   :  { %5301 = sst [smem:[#allocation12_spill]] %s4632_s12 }
  0x17   :  { %5302 = sst [smem:[#allocation13_spill]] %s4637_s20 }
  0x18   :  { %s4657_s20 = sld [smem:[%s5291_s0 + %s4531_s15]]   ;;  %s4535_s15 = smov 23  }
  0x19   :  { %5303 = sst [smem:[#allocation14_spill]] %s4647_s4 }
  0x1a   :  { %5304 = sst [smem:[#allocation15_spill]] %s4652_s9 }
  0x1b   :  { %s4662_s12 = sld [smem:[%s5291_s0 + %s4532_s22]]   ;;  %s4536_s22 = smov 24  }
  0x1c   :  { %s4667_s4 = sld [smem:[%s5291_s0 + %s4533_s28]]   ;;  %s4537_s28 = smov 25  }
  0x1d   :  { %s4672_s9 = sld [smem:[%s5291_s0 + %s4534_s7]]   ;;  %s4538_s7 = smov 26  }
  0x1e   :  { %5305 = sst [smem:[#allocation16_spill]] %s4657_s20 }
  0x1f   :  { %s4677_s20 = sld [smem:[%s5291_s0 + %s4535_s15]]   ;;  %s4539_s15 = smov 27  }
  0x21   :  { %5306 = sst [smem:[#allocation17_spill]] %s4662_s12 }
  0x22   :  { %5307 = sst [smem:[#allocation18_spill]] %s4667_s4 }
  0x23   :  { %5308 = sst [smem:[#allocation19_spill]] %s4672_s9 }
  0x24   :  { %s4682_s12 = sld [smem:[%s5291_s0 + %s4536_s22]]   ;;  %s4540_s22 = smov 28  }
  0x25   :  { %5309 = sst [smem:[#allocation20_spill]] %s4677_s20 }
  0x26   :  { %s4687_s4 = sld [smem:[%s5291_s0 + %s4537_s28]]   ;;  %s4541_s28 = smov 29  }
  0x27   :  { %s4692_s9 = sld [smem:[%s5291_s0 + %s4538_s7]]  }
  0x28   :  { %s4697_s20 = sld [smem:[%s5291_s0 + %s4539_s15]]  }
  0x2a   :  { %5310 = sst [smem:[#allocation21_spill]] %s4682_s12 }
  0x2b   :  { %s4702_s12 = sld [smem:[%s5291_s0 + %s4540_s22]]  }
  0x2c   :  { %5311 = sst [smem:[#allocation22_spill]] %s4687_s4 }
  0x2d   :  { %s4707_s4 = sld [smem:[%s5291_s0 + %s4541_s28]]  }
  0x2e   :  { %64 = vsyncpa [#allocation3], 0 }
  0x2f   :  { %65 = vsyncpa [#allocation6], 0 }
  0x30   :  { %66 = vsyncpa [#allocation4], 0  ;;  %s4542_s7 = smov [#allocation2]   ;;  %s4543_s11 = smov [#allocation5]  }
  0x31   :  { %s79_s10 = sshll.u32 %s4542_s7, 4  ;;  %s91_s15 = sshll.u32 %s4543_s11, 4  ;;  %s80_s10 = int_to_ptr.vmem [resolvable:$true] %s79_s10  ;;  %s92_s15 = int_to_ptr.vmem [resolvable:$true] %s91_s15 }
  0x32   :  { %s4441_s16 = scalar_lea.hbm %s4577_s17, 16 }
  0x33   :  { %p4442_p0 = scmp.ne.s32.totalorder %s4577_s17, %s4441_s16  ;;  %p4445_p1 = scmp.lt.u32.totalorder %s4441_s16, %s4577_s17 }
  0x35   :  { %p4447_p2 = pnand %p4445_p1, %p4442_p0 }
  0x37   :  { %4450 = shalt.err (!%p4447_p2)
}
  0x38   :  { %s4451_s18 = scalar_lea.vmem %s80_s10, 16  ;;  %s4455_s0 = scalar_lea.vmem %s80_s10, 32 }
  0x39   :  { %p4452_p3 = scmp.ne.s32.totalorder %s80_s10, %s4451_s18  ;;  %p4456_p4 = scmp.lt.s32.totalorder %s80_s10, %s80_s10 }
  0x3a   :  { %p4457_p5 = scmp.lt.s32.totalorder %s4455_s0, %s4451_s18 }
  0x3c   :  { %p4458_p6 = por %p4457_p5, %p4456_p4 }
  0x3e   :  { %p4459_p7 = pnand %p4458_p6, %p4452_p3 }
  0x40   :  { %4462 = shalt.err (!%p4459_p7)
}
  0x41   :  { %82 = dma.hbm_to_vmem [thread:$0]  %s4577_s17, 16, %s80_s10, [#allocation3]  }
  0x42   :  { %s4463_s22 = scalar_lea.hbm %s4587_s25, 16 }
  0x43   :  { %p4464_p8 = scmp.ne.s32.totalorder %s4587_s25, %s4463_s22  ;;  %p4467_p9 = scmp.lt.u32.totalorder %s4463_s22, %s4587_s25 }
  0x45   :  { %p4469_p10 = pnand %p4467_p9, %p4464_p8 }
  0x47   :  { %4472 = shalt.err (!%p4469_p10)
}
  0x48   :  { %s4473_s23 = scalar_lea.vmem %s92_s15, 16  ;;  %s4477_s26 = scalar_lea.vmem %s92_s15, 32 }
  0x49   :  { %p4474_p11 = scmp.ne.s32.totalorder %s92_s15, %s4473_s23  ;;  %p4478_p12 = scmp.lt.s32.totalorder %s92_s15, %s92_s15 }
  0x4a   :  { %p4479_p13 = scmp.lt.s32.totalorder %s4477_s26, %s4473_s23 }
  0x4c   :  { %p4480_p0 = por %p4479_p13, %p4478_p12 }
  0x4e   :  { %p4481_p1 = pnand %p4480_p0, %p4474_p11 }
  0x50   :  { %4484 = shalt.err (!%p4481_p1)
}
  0x51   :  { %94 = dma.hbm_to_vmem [thread:$0]  %s4587_s25, 16, %s92_s15, [#allocation6]  }
  0x52   :  { %4507 = dma.done.wait [#allocation3], 16  }
  0x53   :  { %4508 = vsyncadd [#allocation3], 4294967280 }
  0x54   :  { %4509 = dma.done.wait [#allocation6], 16  }
  0x55   :  { %4510 = vsyncadd [#allocation6], 4294967280  ;;  %v4544_v0 = vmov 0.0   ;;  %vm4545_vm0 = vmmov 0   ;;  %vm168_vm1 = vcmask 1045504   ;;  %vm158_vm2 = vcmask 48128  }
  0x56   :  { %3767 = vmatprep.subr.mxu0 %v4544_v0  ;;  %3769 = vmatprep.mubr.msk.f32.mxu0 %vm4545_vm0, %v4544_v0  ;;  %v150_v1 = vld [vmem:[%s4572_s13] sm:$0x3f]  ;;  %v149_v3 = vld [vmem:[%s4562_s5 + $0x10] sm:$0xff]  ;;  %v148_v4 = vld [vmem:[%s4562_s5 + $0x8] sm:$0xff]  ;;  %v4546_v8 = vmov 0.0|0.0   ;;  %vm264_vm3 = vcmask 130048  }
  0x57   :  { %4228 = vmatprep.subr.mxu1 %v4544_v0  ;;  %3775 = vmatprep.mubr.msk.f32.mxu1 %vm4545_vm0, %v4544_v0  ;;  %v147_v2 = vld [vmem:[%s4562_s5] sm:$0xff]  ;;  %v256_v6 = vld [vmem:[%s4582_s21 + $0x8] sm:$0xff]  ;;  %s4547_s5 = smov 96   ;;  %vm4793_vm4 = vmpackc.low %vm264_vm3, %vm264_vm3  ;;  %vm621_vm5 = vcmask 195584   ;;  %s4548_s13 = smov 64   ;;  %vm1192_vm6 = vcmask 261120  }
  0x58   :  { %3768 = vmatpush3.msk.msra.mxu0 %vm168_vm1, %v150_v1  ;;  %4229 = vmatpush3.msk.msra.mxu1 %vm168_vm1, %v150_v1  ;;  %v255_v5 = vld [vmem:[%s4582_s21] sm:$0xff]  ;;  %v415_v51 = vld [vmem:[%s4602_s8 + $0x8] sm:$0xff]  ;;  %s4549_s17 = smov 80   ;;  %s4550_s21 = smov 112   ;;  %vm3036_vm7 = vcmask 64512   ;;  %vm3338_vm8 = vcmask 7168  }
  0x59   :  { %3770 = vmatmul.mubr.msk.f32.vlgmr.msra.gmra.mrb[0].mxu0 %vm158_vm2, %v147_v2  ;;  %3776 = vmatmul.mubr.msk.f32.vlgmr.msra.gmra.mrb[0].mxu1 %vm158_vm2, %v149_v3  ;;  %v4144_v7 = vpack.c.bf16 %v256_v6, %v255_v5  ;;  %v3478_v9 = vld [vmem:[#allocation2] ss:$0 sm:$0xff]  ;;  %v3483_v22 = vld [vmem:[#allocation5] ss:$0 sm:$0xff]  ;;  %s4551_s25 = smov 48   ;;  %s5314_s28 = sld [smem:[#allocation12_spill]] }
  0x5a   :  { %3772 = vmatprep.mubr.msk.f32.mxu0 %vm4545_vm0, %v4544_v0  ;;  %3782 = vmatprep.mubr.msk.f32.mxu1 %vm4545_vm0, %v4544_v0  ;;  %v414_v50 = vld [vmem:[%s4602_s8] sm:$0xff]  ;;  %s5315_s1 = sld [smem:[#allocation13_spill]]  ;;  %s5316_s2 = sld [smem:[#allocation15_spill]]  ;;  %vm3431_vm11 = vcmask 24576  }
  0x5b   :  { %4143 = vmatprep.subr.bf16.mxu1 %v4546_v8  ;;  %4146 = vmatprep.subr.bf16.mxu0 %v4546_v8  ;;  %v4147_v52 = vpack.c.bf16 %v415_v51, %v414_v50  ;;  %v3487_v63 = vld [vmem:[%s4592_s29] ss:$0 sm:$0xff]  ;;  %s5317_s7 = sld [smem:[#allocation14_spill]]  ;;  %s5318_s10 = sld [smem:[#allocation16_spill]] }
  0x5c   :  { %4145 = vmatpush3.bf16.msra.mxu1 %v4144_v7  ;;  %v3488_v2 = vld [vmem:[%s4597_s3] ss:$0 sm:$0xff]  ;;  %s5324_s11 = sld [smem:[#allocation20_spill]]  ;;  %s5325_s15 = sld [smem:[#allocation21_spill]] }
  0x5d   :  { %3773 = vmatmul.mubr.msk.f32.gmra.mrb[2].mxu0 %vm158_vm2, %v148_v4  ;;  %4149 = vmatprep.subr.bf16.mxu1 %v4546_v8 }
  0x5e   :  { %3795 = vmatprep.mubr.msk.f32.mxu0 %vm4545_vm0, %v4544_v0  ;;  %4148 = vmatpush3.bf16.msra.mxu0 %v4147_v52 }
  0x5f   :  { %4153 = vmatprep.subr.bf16.mxu0 %v4546_v8 }
 0x12c   :  { %v238_v10 = vpop.f32.mrb[0].mxu0  ;;  %v248_v11 = vpop.f32.mrb[0].mxu1 }
 0x12d   :  { %v239_v12 = vadd.f32 %v3478_v9, %v238_v10  ;;  %v3771_v13 = vpop.f32.mrb[1].mxu0  ;;  %v3777_v14 = vpop.f32.mrb[1].mxu1  ;;  %v249_v19 = vadd.f32 %v3478_v9, %v248_v11 }
 0x12f   :  { %v252_v15 = vmax.f32 %v239_v12, 0.0  ;;  %v254_v21 = vmax.f32 %v249_v19, 0.0 }
 0x130   :  { %v243_v16 = vpop.f32.mrb[2].mxu0 }
 0x131   :  { %v244_v17 = vadd.f32 %v3478_v9, %v243_v16  ;;  %v3774_v18 = vpop.f32.mrb[3].mxu0  ;;  %3783 = vmatmul.mubr.msk.f32.vlgmr.msra.gmra.mrb[2].mxu1 %vm264_vm3, %v252_v15  ;;  %v3489_v16 = vld [vmem:[%s4607_s14] ss:$0 sm:$0xff] }
 0x132   :  { %3785 = vmatprep.mubr.msk.f32.mxu1 %vm4545_vm0, %v4544_v0 }
 0x133   :  { %v253_v20 = vmax.f32 %v244_v17, 0.0 }
 0x135   :  { %3786 = vmatmul.mubr.msk.f32.gmra.mrb[4].mxu1 %vm264_vm3, %v253_v20 }
 0x136   :  { %3788 = vmatprep.mubr.msk.f32.mxu1 %vm4545_vm0, %v4544_v0 }
 0x139   :  { %3789 = vmatmul.mubr.msk.f32.gmra.mrb[6].mxu1 %vm264_vm3, %v254_v21 }
 0x13a   :  { %3810 = vmatprep.mubr.msk.f32.mxu1 %vm4545_vm0, %v4544_v0 }
 0x204   :  { %v340_v23 = vpop.f32.mrb[2].mxu1 }
 0x205   :  { %v4747_v24 = vadd.f32 %v3483_v22, %v340_v23  ;;  %v3784_v25 = vpop.f32.mrb[3].mxu1 }
 0x207   :  { %v356_v26 = vsel %vm264_vm3, %v4747_v24, 0.0 }
 0x208   :  { %357 = vadd.xlane.f32.xlu0 %v356_v26  ;;  %v345_v27 = vpop.f32.mrb[4].mxu1 }
 0x209   :  { %v4751_v28 = vadd.f32 %v3483_v22, %v345_v27  ;;  %v3787_v29 = vpop.f32.mrb[5].mxu1 }
 0x20b   :  { %v359_v30 = vsel %vm264_vm3, %v4751_v28, 0.0 }
 0x20c   :  { %360 = vadd.xlane.f32.xlu0 %v359_v30  ;;  %v350_v31 = vpop.f32.mrb[6].mxu1 }
 0x20d   :  { %v4755_v32 = vadd.f32 %v3483_v22, %v350_v31  ;;  %v3790_v33 = vpop.f32.mrb[7].mxu1 }
 0x20f   :  { %v362_v34 = vsel %vm264_vm3, %v4755_v32, 0.0 }
 0x210   :  { %363 = vadd.xlane.f32.xlu1 %v362_v34 }
 0x295   :  { %v358_v35 = vpop.xlane.xlu0 %357 }
 0x296   :  { %v366_v36 = vmul.f32 0.0625, %v358_v35 }
 0x298   :  { %v369_v37 = vsub.f32 %v4747_v24, %v366_v36 }
 0x299   :  { %v361_v38 = vpop.xlane.xlu0 %360 }
 0x29a   :  { %v367_v39 = vmul.f32 0.0625, %v361_v38  ;;  %v372_v40 = vmul.f32 %v369_v37, %v369_v37 }
 0x29c   :  { %v370_v41 = vsub.f32 %v4751_v28, %v367_v39  ;;  %v375_v42 = vsel %vm264_vm3, %v372_v40, 0.0 }
 0x29d   :  { %376 = vadd.xlane.f32.xlu1 %v375_v42  ;;  %v364_v43 = vpop.xlane.xlu1 %363 }
 0x29e   :  { %v368_v44 = vmul.f32 0.0625, %v364_v43  ;;  %v373_v45 = vmul.f32 %v370_v41, %v370_v41 }
 0x2a0   :  { %v371_v46 = vsub.f32 %v4755_v32, %v368_v44  ;;  %v378_v47 = vsel %vm264_vm3, %v373_v45, 0.0 }
 0x2a1   :  { %379 = vadd.xlane.f32.xlu0 %v378_v47 }
 0x2a2   :  { %v374_v48 = vmul.f32 %v371_v46, %v371_v46 }
 0x2a4   :  { %v381_v49 = vsel %vm264_vm3, %v374_v48, 0.0 }
 0x2a5   :  { %382 = vadd.xlane.f32.xlu1 %v381_v49 }
 0x32a   :  { %v377_v53 = vpop.xlane.xlu1 %376 }
 0x32b   :  { %v384_v54 = vmul.f32 0.0625, %v377_v53 }
 0x32d   :  { %v387_v55 = vadd.f32 1e-05, %v384_v54 }
 0x32e   :  { %v380_v56 = vpop.xlane.xlu0 %379 }
 0x32f   :  { %4351 = vrsqrt.f32 %v387_v55  ;;  %v385_v57 = vmul.f32 0.0625, %v380_v56 }
 0x331   :  { %v388_v58 = vadd.f32 1e-05, %v385_v57 }
 0x332   :  { %v383_v59 = vpop.xlane.xlu1 %382 }
 0x333   :  { %4353 = vrsqrt.f32 %v388_v58  ;;  %v386_v60 = vmul.f32 0.0625, %v383_v59 }
 0x335   :  { %v389_v61 = vadd.f32 1e-05, %v386_v60 }
 0x337   :  { %4355 = vrsqrt.f32 %v389_v61  ;;  %v512_v61 = vld [vmem:[%s4612_s19] sm:$0xff] }
 0x339   :  { %v4352_v62 = vpop.eup %4351 }
 0x33a   :  { %v393_v1 = vmul.f32 %v4352_v62, %v369_v37  ;;  %v513_v62 = vld [vmem:[%s4612_s19 + $0x8] sm:$0xff] }
 0x33c   :  { %v402_v3 = vmul.f32 %v3487_v63, %v393_v1 }
 0x33d   :  { %v4354_v4 = vpop.eup %4353 }
 0x33e   :  { %v411_v5 = vadd.f32 %v3488_v2, %v402_v3  ;;  %v394_v6 = vmul.f32 %v4354_v4, %v370_v41 }
 0x340   :  { %3796 = vmatmul.mubr.msk.f32.vlgmr.msra.gmra.mrb[4].mxu0 %vm264_vm3, %v411_v5  ;;  %v403_v7 = vmul.f32 %v3487_v63, %v394_v6 }
 0x341   :  { %v4356_v9 = vpop.eup %4355  ;;  %3798 = vmatprep.mubr.msk.f32.mxu0 %vm4545_vm0, %v4544_v0 }
 0x342   :  { %v412_v10 = vadd.f32 %v3488_v2, %v403_v7  ;;  %v395_v11 = vmul.f32 %v4356_v9, %v371_v46 }
 0x344   :  { %3799 = vmatmul.mubr.msk.f32.gmra.mrb[6].mxu0 %vm264_vm3, %v412_v10  ;;  %v404_v12 = vmul.f32 %v3487_v63, %v395_v11  ;;  %v4157_v63 = vpack.c.bf16 %v513_v62, %v512_v61 }
 0x345   :  { %3801 = vmatprep.mubr.msk.f32.mxu0 %vm4545_vm0, %v4544_v0 }
 0x346   :  { %v413_v13 = vadd.f32 %v3488_v2, %v404_v12 }
 0x348   :  { %3802 = vmatmul.mubr.msk.f32.gmra.mrb[8].mxu0 %vm264_vm3, %v413_v13 }
 0x349   :  { %3825 = vmatprep.mubr.msk.f32.mxu0 %vm4545_vm0, %v4544_v0 }
 0x413   :  { %v498_v14 = vpop.f32.mrb[4].mxu0 }
 0x414   :  { %v3797_v15 = vpop.f32.mrb[5].mxu0  ;;  %v499_v18 = vadd.f32 %v3489_v16, %v498_v14 }
 0x417   :  { %v503_v17 = vpop.f32.mrb[6].mxu0 }
 0x418   :  { %v4780_v19 = vadd.f32 %v3489_v16, %v503_v17  ;;  %v3800_v20 = vpop.f32.mrb[7].mxu0 }
 0x41a   :  { %v4783_v21 = vpack.i.bf16 %v4780_v19, %v499_v18 }
 0x41b   :  { %v508_v22 = vpop.f32.mrb[8].mxu0 }
 0x41c   :  { %v4785_v23 = vadd.f32 %v3489_v16, %v508_v22  ;;  %4310 = vrot.lane.b32.xlu0 %v4783_v21, %s4547_s5  ;;  %v3803_v25 = vpop.f32.mrb[9].mxu0 }
 0x41e   :  { %524 = vrot.lane.b32.xlu1 %v4785_v23, %s4547_s5 }
 0x48e   :  { %v4311_v26 = vpop.permute.xlu0 %4310 }
 0x48f   :  { %v4313_v27 = vunpack.i.h.bf16 %v4311_v26  ;;  %v4312_v29 = vunpack.i.l.bf16 %v4311_v26 }
 0x490   :  { %v525_v33 = vpop.permute.xlu1 %524 }
 0x491   :  { %v4150_v31 = vpack.c.bf16 %v4313_v27, %v4312_v29 }
 0x493   :  { %4152 = vmatpush3.bf16.xpose.msk.msra.mxu1 %vm4793_vm4, %v4150_v31 }
 0x494   :  { %3808 = vmatprep.subr.mxu1 %v4544_v0 }
 0x49b   :  { %3809 = vmatpush3.xpose.msk.msra.mxu1 %vm264_vm3, %v525_v33 }
 0x49c   :  { %4156 = vmatprep.subr.bf16.mxu1 %v4546_v8 }
 0x49e   :  { %3811 = vmatmul.mubr.msk.f32.vlgmr.msra.gmra.mrb[8].mxu1 %vm264_vm3, %v499_v18 }
 0x49f   :  { %3813 = vmatprep.mubr.msk.f32.mxu1 %vm4545_vm0, %v4544_v0  ;;  %4158 = vmatpush3.bf16.msra.mxu1 %v4157_v63 }
 0x4a0   :  { %4163 = vmatprep.subr.bf16.mxu1 %v4546_v8 }
 0x4a2   :  { %3814 = vmatmul.mubr.msk.f32.gmra.mrb[10].mxu1 %vm264_vm3, %v4780_v19 }
 0x4a3   :  { %3816 = vmatprep.mubr.msk.f32.mxu1 %vm4545_vm0, %v4544_v0 }
 0x4a6   :  { %3817 = vmatmul.mubr.msk.f32.gmra.mrb[12].mxu1 %vm264_vm3, %v4785_v23 }
 0x4a7   :  { %3838 = vmatprep.mubr.msk.f32.mxu1 %vm4545_vm0, %v4544_v0 }
 0x571   :  { %v604_v34 = vpop.f32.mrb[8].mxu1 }
 0x572   :  { %v618_v35 = vmul.f32 0.25, %v604_v34  ;;  %v3812_v36 = vpop.f32.mrb[9].mxu1 }
 0x574   :  { %v622_v37 = vsel %vm621_vm5, %v618_v35, -inf }
 0x575   :  { %623 = vmax.xlane.f32.xlu1 %v622_v37  ;;  %v609_v38 = vpop.f32.mrb[10].mxu1 }
 0x576   :  { %v619_v39 = vmul.f32 0.25, %v609_v38  ;;  %v3815_v40 = vpop.f32.mrb[11].mxu1 }
 0x578   :  { %v625_v41 = vsel %vm621_vm5, %v619_v39, -inf }
 0x579   :  { %626 = vmax.xlane.f32.xlu0 %v625_v41  ;;  %v614_v42 = vpop.f32.mrb[12].mxu1 }
 0x57a   :  { %v620_v43 = vmul.f32 0.25, %v614_v42  ;;  %v3818_v44 = vpop.f32.mrb[13].mxu1 }
 0x57c   :  { %v628_v45 = vsel %vm621_vm5, %v620_v43, -inf }
 0x57d   :  { %629 = vmax.xlane.f32.xlu0 %v628_v45 }
 0x602   :  { %v624_v46 = vpop.xlane.xlu1 %623 }
 0x603   :  { %v631_v47 = vsub.f32 %v618_v35, %v624_v46 }
 0x605   :  { %v634_v48 = vmul.f32 1.442695, %v631_v47 }
 0x606   :  { %v627_v49 = vpop.xlane.xlu0 %626 }
 0x607   :  { %4357 = vpow2.f32 %v634_v48  ;;  %v632_v50 = vsub.f32 %v619_v39, %v627_v49 }
 0x609   :  { %v636_v51 = vmul.f32 1.442695, %v632_v50 }
 0x60a   :  { %v630_v56 = vpop.xlane.xlu0 %629 }
 0x60b   :  { %4359 = vpow2.f32 %v636_v51  ;;  %v633_v57 = vsub.f32 %v620_v43, %v630_v56 }
 0x60d   :  { %v638_v58 = vmul.f32 1.442695, %v633_v57 }
 0x60f   :  { %4361 = vpow2.f32 %v638_v58 }
 0x611   :  { %v4358_v52 = vpop.eup %4357 }
 0x612   :  { %v640_v53 = vsel %vm621_vm5, %v4358_v52, 0.0 }
 0x613   :  { %641 = vadd.xlane.f32.xlu1 %v640_v53 }
 0x615   :  { %v4360_v54 = vpop.eup %4359 }
 0x616   :  { %v643_v55 = vsel %vm621_vm5, %v4360_v54, 0.0 }
 0x617   :  { %644 = vadd.xlane.f32.xlu0 %v643_v55 }
 0x619   :  { %v4362_v59 = vpop.eup %4361 }
 0x61a   :  { %v646_v60 = vsel %vm621_vm5, %v4362_v59, 0.0 }
 0x624   :  { %659 = vrot.lane.b32.xlu1 %v4785_v23, %s4548_s13 }
 0x628   :  { %4320 = vrot.lane.b32.xlu1 %v4783_v21, %s4549_s17 }
 0x62c   :  { %861 = vrot.lane.b32.xlu1 %v4785_v23, %s4549_s17 }
 0x62d   :  { %4315 = vrot.lane.b32.xlu0 %v4783_v21, %s4548_s13 }
 0x631   :  { %851 = vrot.lane.b32.xlu0 %v499_v18, %s4550_s21 }
 0x635   :  { %855 = vrot.lane.b32.xlu0 %v4785_v23, %s4550_s21 }
 0x650   :  { %647 = vadd.xlane.f32.xlu1 %v646_v60 }
 0x661   :  { %853 = vrot.lane.b32.xlu1 %v4780_v19, %s4550_s21 }
 0x6a0   :  { %v642_v1 = vpop.xlane.xlu1 %641 }
 0x6a1   :  { %4363 = vrcp.f32 %v642_v1 }
 0x6a4   :  { %v645_v2 = vpop.xlane.xlu0 %644  ;;  %v660_v4 = vpop.permute.xlu1 %659 }
 0x6a5   :  { %4365 = vrcp.f32 %v645_v2 }
 0x6a8   :  { %v4316_v3 = vpop.permute.xlu0 %4315  ;;  %v4321_v10 = vpop.permute.xlu1 %4320 }
 0x6a9   :  { %v4318_v5 = vunpack.i.h.bf16 %v4316_v3  ;;  %v4317_v6 = vunpack.i.l.bf16 %v4316_v3  ;;  %v4323_v13 = vunpack.i.h.bf16 %v4321_v10  ;;  %v4322_v14 = vunpack.i.l.bf16 %v4321_v10 }
 0x6ab   :  { %v4154_v7 = vpack.c.bf16 %v4318_v5, %v4317_v6  ;;  %v4364_v9 = vpop.eup %4363  ;;  %v4160_v16 = vpack.c.bf16 %v4323_v13, %v4322_v14 }
 0x6ac   :  { %v652_v11 = vmul.f32 %v4364_v9, %v4358_v52  ;;  %v862_v17 = vpop.permute.xlu1 %861  ;;  %v852_v22 = vpop.permute.xlu0 %851  ;;  %v515_v9 = vld [vmem:[%s4612_s19 + $0x18] sm:$0xff] }
 0x6ad   :  { %4155 = vmatpush3.bf16.msra.mxu0 %v4154_v7  ;;  %v514_v7 = vld [vmem:[%s4612_s19 + $0x10] sm:$0xff] }
 0x6ae   :  { %3823 = vmatprep.subr.mxu0 %v4544_v0 }
 0x6af   :  { %v4366_v12 = vpop.eup %4365 }
 0x6b0   :  { %v653_v15 = vmul.f32 %v4366_v12, %v4360_v54  ;;  %v856_v26 = vpop.permute.xlu0 %855 }
 0x6b1   :  { %3824 = vmatpush3.msra.mxu0 %v660_v4 }
 0x6b2   :  { %3826 = vmatmul.mubr.msk.f32.vlgmr.msra.gmra.mrb[10].mxu0 %vm621_vm5, %v652_v11  ;;  %4159 = vmatprep.subr.bf16.mxu0 %v4546_v8 }
 0x6b3   :  { %3828 = vmatprep.mubr.msk.f32.mxu0 %vm4545_vm0, %v4544_v0 }
 0x6b6   :  { %3829 = vmatmul.mubr.msk.f32.gmra.mrb[12].mxu0 %vm621_vm5, %v653_v15 }
 0x6b7   :  { %3831 = vmatprep.mubr.msk.f32.mxu0 %vm4545_vm0, %v4544_v0 }
 0x6b8   :  { %4162 = vmatpush3.bf16.xpose.msk.msra.mxu0 %vm4793_vm4, %v4160_v16  ;;  %v1181_v16 = vld [vmem:[%s4622_s30] sm:$0xff] }
 0x6b9   :  { %3851 = vmatprep.subr.mxu0 %v4544_v0 }
 0x6c0   :  { %3852 = vmatpush3.xpose.msk.msra.mxu0 %vm264_vm3, %v862_v17  ;;  %v1182_v17 = vld [vmem:[%s4622_s30 + $0x8] sm:$0xff] }
 0x6c1   :  { %4169 = vmatprep.subr.bf16.mxu0 %v4546_v8 }
 0x6dd   :  { %v648_v18 = vpop.xlane.xlu1 %647 }
 0x6de   :  { %4367 = vrcp.f32 %v648_v18  ;;  %v4170_v18 = vpack.c.bf16 %v1182_v17, %v1181_v16 }
 0x6e1   :  { %v854_v25 = vpop.permute.xlu1 %853 }
 0x6e8   :  { %v4368_v19 = vpop.eup %4367 }
 0x6e9   :  { %v654_v20 = vmul.f32 %v4368_v19, %v4362_v59 }
 0x6eb   :  { %3832 = vmatmul.mubr.msk.f32.gmra.mrb[14].mxu0 %vm621_vm5, %v654_v20 }
 0x6ec   :  { %3853 = vmatprep.mubr.msk.f32.mxu0 %vm4545_vm0, %v4544_v0 }
 0x6ef   :  { %3854 = vmatmul.mubr.msk.f32.vlgmr.msra.gmra.mrb[16].mxu0 %vm264_vm3, %v852_v22 }
 0x6f0   :  { %3856 = vmatprep.mubr.msk.f32.mxu0 %vm4545_vm0, %v4544_v0  ;;  %4171 = vmatpush3.bf16.msra.mxu0 %v4170_v18 }
 0x6f1   :  { %4172 = vmatprep.subr.bf16.mxu0 %v4546_v8 }
 0x6f3   :  { %3857 = vmatmul.mubr.msk.f32.gmra.mrb[18].mxu0 %vm264_vm3, %v854_v25 }
 0x6f4   :  { %3859 = vmatprep.mubr.msk.f32.mxu0 %vm4545_vm0, %v4544_v0 }
 0x6f7   :  { %3860 = vmatmul.mubr.msk.f32.gmra.mrb[20].mxu0 %vm264_vm3, %v856_v26 }
 0x6f8   :  { %3898 = vmatprep.mubr.msk.f32.mxu0 %vm4545_vm0, %v4544_v0 }
 0x785   :  { %v739_v27 = vpop.f32.mrb[10].mxu0 }
 0x786   :  { %v3827_v29 = vpop.f32.mrb[11].mxu0  ;;  %3839 = vmatmul.mubr.msk.f32.vlgmr.msra.gmra.mrb[14].mxu1 %vm264_vm3, %v739_v27 }
 0x787   :  { %3841 = vmatprep.mubr.msk.f32.mxu1 %vm4545_vm0, %v4544_v0  ;;  %v1183_v29 = vld [vmem:[%s4622_s30 + $0x10] sm:$0xff] }
 0x789   :  { %v744_v31 = vpop.f32.mrb[12].mxu0 }
 0x78a   :  { %v3830_v33 = vpop.f32.mrb[13].mxu0  ;;  %3842 = vmatmul.mubr.msk.f32.gmra.mrb[16].mxu1 %vm264_vm3, %v744_v31  ;;  %v1184_v31 = vld [vmem:[%s4622_s30 + $0x18] sm:$0xff] }
 0x78b   :  { %3844 = vmatprep.mubr.msk.f32.mxu1 %vm4545_vm0, %v4544_v0  ;;  %v4173_v33 = vpack.c.bf16 %v1184_v31, %v1183_v29  ;;  %v3523_v31 = vld [vmem:[%s5315_s1] ss:$0 sm:$0xff] }
 0x78d   :  { %4174 = vmatpush3.bf16.msra.mxu0 %v4173_v33 }
 0x78e   :  { %4175 = vmatprep.subr.bf16.mxu0 %v4546_v8 }
 0x7be   :  { %v749_v34 = vpop.f32.mrb[14].mxu0 }
 0x7bf   :  { %v3833_v35 = vpop.f32.mrb[15].mxu0  ;;  %3845 = vmatmul.mubr.msk.f32.gmra.mrb[18].mxu1 %vm264_vm3, %v749_v34  ;;  %v3505_v34 = vld [vmem:[%s4617_s24] ss:$0 sm:$0xff] }
 0x7c0   :  { %3868 = vmatprep.mubr.msk.f32.mxu1 %vm4545_vm0, %v4544_v0 }
 0x7c2   :  { %v941_v36 = vpop.f32.mrb[16].mxu0 }
 0x7c3   :  { %v955_v37 = vmul.f32 0.25, %v941_v36  ;;  %v3855_v38 = vpop.f32.mrb[17].mxu0 }
 0x7c5   :  { %v958_v39 = vsel %vm621_vm5, %v955_v37, -inf }
 0x7c6   :  { %959 = vmax.xlane.f32.xlu1 %v958_v39  ;;  %v946_v40 = vpop.f32.mrb[18].mxu0 }
 0x7c7   :  { %v956_v41 = vmul.f32 0.25, %v946_v40  ;;  %v3858_v42 = vpop.f32.mrb[19].mxu0 }
 0x7c9   :  { %v961_v43 = vsel %vm621_vm5, %v956_v41, -inf }
 0x7ca   :  { %962 = vmax.xlane.f32.xlu0 %v961_v43  ;;  %v951_v44 = vpop.f32.mrb[20].mxu0 }
 0x7cb   :  { %v957_v45 = vmul.f32 0.25, %v951_v44  ;;  %v3861_v46 = vpop.f32.mrb[21].mxu0  ;;  %v3518_v44 = vld [vmem:[%s4627_s6] ss:$0 sm:$0xff] }
 0x7cd   :  { %v964_v47 = vsel %vm621_vm5, %v957_v45, -inf }
 0x7ce   :  { %965 = vmax.xlane.f32.xlu0 %v964_v47 }
 0x853   :  { %v960_v48 = vpop.xlane.xlu1 %959 }
 0x854   :  { %v967_v49 = vsub.f32 %v955_v37, %v960_v48 }
 0x856   :  { %v970_v50 = vmul.f32 1.442695, %v967_v49 }
 0x857   :  { %v963_v51 = vpop.xlane.xlu0 %962 }
 0x858   :  { %4369 = vpow2.f32 %v970_v50  ;;  %v968_v52 = vsub.f32 %v956_v41, %v963_v51 }
 0x85a   :  { %v972_v53 = vmul.f32 1.442695, %v968_v52 }
 0x85b   :  { %v966_v54 = vpop.xlane.xlu0 %965 }
 0x85c   :  { %4371 = vpow2.f32 %v972_v53  ;;  %v969_v55 = vsub.f32 %v957_v45, %v966_v54 }
 0x85e   :  { %v974_v56 = vmul.f32 1.442695, %v969_v55 }
 0x860   :  { %4373 = vpow2.f32 %v974_v56 }
 0x862   :  { %v4370_v57 = vpop.eup %4369 }
 0x863   :  { %v976_v58 = vsel %vm621_vm5, %v4370_v57, 0.0 }
 0x864   :  { %977 = vadd.xlane.f32.xlu0 %v976_v58 }
 0x866   :  { %v4372_v59 = vpop.eup %4371 }
 0x867   :  { %v979_v60 = vsel %vm621_vm5, %v4372_v59, 0.0 }
 0x868   :  { %980 = vadd.xlane.f32.xlu1 %v979_v60 }
 0x86a   :  { %v4374_v61 = vpop.eup %4373 }
 0x86b   :  { %v982_v62 = vsel %vm621_vm5, %v4374_v61, 0.0 }
 0x86c   :  { %983 = vadd.xlane.f32.xlu0 %v982_v62 }
 0x879   :  { %4325 = vrot.lane.b32.xlu1 %v4783_v21, %s4551_s25  ;;  %v4167_v21 = vpack.c.bf16 %v515_v9, %v514_v7 }
 0x882   :  { %995 = vrot.lane.b32.xlu0 %v4785_v23, %s4551_s25 }
 0x8f1   :  { %v978_v63 = vpop.xlane.xlu0 %977 }
 0x8f2   :  { %4375 = vrcp.f32 %v978_v63 }
 0x8f5   :  { %v981_v1 = vpop.xlane.xlu1 %980 }
 0x8f6   :  { %4377 = vrcp.f32 %v981_v1 }
 0x8f9   :  { %v4326_v2 = vpop.permute.xlu1 %4325  ;;  %v984_v3 = vpop.xlane.xlu0 %983 }
 0x8fa   :  { %v4328_v4 = vunpack.i.h.bf16 %v4326_v2  ;;  %v4327_v5 = vunpack.i.l.bf16 %v4326_v2  ;;  %4379 = vrcp.f32 %v984_v3 }
 0x8fc   :  { %v4164_v6 = vpack.c.bf16 %v4328_v4, %v4327_v5  ;;  %v4376_v10 = vpop.eup %4375 }
 0x8fd   :  { %v988_v11 = vmul.f32 %v4376_v10, %v4370_v57  ;;  %v996_v23 = vpop.permute.xlu0 %995 }
 0x8fe   :  { %4165 = vmatpush3.bf16.msra.mxu1 %v4164_v6 }
 0x8ff   :  { %3866 = vmatprep.subr.mxu1 %v4544_v0 }
 0x900   :  { %v4378_v12 = vpop.eup %4377 }
 0x901   :  { %v989_v13 = vmul.f32 %v4378_v12, %v4372_v59  ;;  %v1345_v12 = vld [vmem:[%s4642_s27 + $0x8] sm:$0xff] }
 0x902   :  { %3867 = vmatpush3.msra.mxu1 %v996_v23  ;;  %v1344_v23 = vld [vmem:[%s4642_s27] sm:$0xff] }
 0x903   :  { %3869 = vmatmul.mubr.msk.f32.vlgmr.msra.gmra.mrb[20].mxu1 %vm621_vm5, %v988_v11  ;;  %4166 = vmatprep.subr.bf16.mxu1 %v4546_v8 }
 0x904   :  { %3871 = vmatprep.mubr.msk.f32.mxu1 %vm4545_vm0, %v4544_v0  ;;  %4168 = vmatpush3.bf16.msra.mxu1 %v4167_v21  ;;  %v4380_v14 = vpop.eup %4379 }
 0x905   :  { %4178 = vmatprep.subr.bf16.mxu1 %v4546_v8  ;;  %v990_v15 = vmul.f32 %v4380_v14, %v4374_v61 }
 0x907   :  { %3872 = vmatmul.mubr.msk.f32.gmra.mrb[22].mxu1 %vm621_vm5, %v989_v13  ;;  %v4176_v13 = vpack.c.bf16 %v1345_v12, %v1344_v23 }
 0x908   :  { %3874 = vmatprep.mubr.msk.f32.mxu1 %vm4545_vm0, %v4544_v0 }
 0x90b   :  { %3875 = vmatmul.mubr.msk.f32.gmra.mrb[24].mxu1 %vm621_vm5, %v990_v15 }
 0x90c   :  { %3881 = vmatprep.mubr.msk.f32.mxu1 %vm4545_vm0, %v4544_v0 }
 0x9d6   :  { %v1075_v19 = vpop.f32.mrb[20].mxu1 }
 0x9d7   :  { %v3870_v20 = vpop.f32.mrb[21].mxu1  ;;  %3882 = vmatmul.mubr.msk.f32.vlgmr.msra.gmra.mrb[14].mxu1 %vm264_vm3, %v1075_v19 }
 0x9d8   :  { %3884 = vmatprep.mubr.msk.f32.mxu1 %vm4545_vm0, %v4544_v0 }
 0x9da   :  { %v1080_v22 = vpop.f32.mrb[22].mxu1 }
 0x9db   :  { %v3873_v25 = vpop.f32.mrb[23].mxu1  ;;  %3885 = vmatmul.mubr.msk.f32.gmra.mrb[16].mxu1 %vm264_vm3, %v1080_v22 }
 0x9dc   :  { %3887 = vmatprep.mubr.msk.f32.mxu1 %vm4545_vm0, %v4544_v0 }
 0x9de   :  { %v1085_v26 = vpop.f32.mrb[24].mxu1 }
 0x9df   :  { %v3876_v27 = vpop.f32.mrb[25].mxu1  ;;  %3888 = vmatmul.mubr.msk.f32.gmra.mrb[18].mxu1 %vm264_vm3, %v1085_v26 }
 0x9e0   :  { %3924 = vmatprep.mubr.msk.f32.mxu1 %vm4545_vm0, %v4544_v0  ;;  %v3522_v27 = vld [vmem:[%s5314_s28] ss:$0 sm:$0xff] }
 0xaaa   :  { %v1164_v35 = vpop.f32.mrb[14].mxu1 }
 0xaab   :  { %v4230_v36 = vadd.f32 %v3505_v34, %v1164_v35  ;;  %v3883_v37 = vpop.f32.mrb[15].mxu1 }
 0xaad   :  { %3899 = vmatmul.mubr.msk.f32.vlgmr.msra.gmra.mrb[22].mxu0 %vm1192_vm6, %v4230_v36 }
 0xaae   :  { %v1169_v38 = vpop.f32.mrb[16].mxu1  ;;  %3901 = vmatprep.mubr.msk.f32.mxu0 %vm4545_vm0, %v4544_v0  ;;  %4177 = vmatpush3.bf16.msra.mxu0 %v4176_v13 }
 0xaaf   :  { %v4231_v39 = vadd.f32 %v3505_v34, %v1169_v38  ;;  %v3886_v40 = vpop.f32.mrb[17].mxu1  ;;  %4181 = vmatprep.subr.bf16.mxu0 %v4546_v8 }
 0xab1   :  { %3902 = vmatmul.mubr.msk.f32.gmra.mrb[24].mxu0 %vm1192_vm6, %v4231_v39 }
 0xab2   :  { %v1174_v41 = vpop.f32.mrb[18].mxu1  ;;  %3904 = vmatprep.mubr.msk.f32.mxu0 %vm4545_vm0, %v4544_v0 }
 0xab3   :  { %v4232_v42 = vadd.f32 %v3505_v34, %v1174_v41  ;;  %v3889_v43 = vpop.f32.mrb[19].mxu1 }
 0xab4   :  { %v1445_v43 = vld [vmem:[%s5316_s2] sm:$0xff] }
 0xab5   :  { %3905 = vmatmul.mubr.msk.f32.gmra.mrb[26].mxu0 %vm1192_vm6, %v4232_v42 }
 0xab6   :  { %3911 = vmatprep.mubr.msk.f32.mxu0 %vm4545_vm0, %v4544_v0 }
 0xb80   :  { %v1268_v45 = vpop.f32.mrb[22].mxu0 }
 0xb81   :  { %v1269_v46 = vadd.f32 %v3518_v44, %v1268_v45  ;;  %v3900_v47 = vpop.f32.mrb[23].mxu0 }
 0xb83   :  { %v4920_v48 = vadd.f32 %v1269_v46, %v4747_v24  ;;  %v3524_v46 = vld [vmem:[%s5317_s7] ss:$0 sm:$0xff] }
 0xb84   :  { %v1273_v49 = vpop.f32.mrb[24].mxu0 }
 0xb85   :  { %v1274_v50 = vadd.f32 %v3518_v44, %v1273_v49  ;;  %v3903_v51 = vpop.f32.mrb[25].mxu0  ;;  %v1287_v52 = vsel %vm264_vm3, %v4920_v48, 0.0 }
 0xb86   :  { %1288 = vadd.xlane.f32.xlu1 %v1287_v52 }
 0xb87   :  { %v4925_v53 = vadd.f32 %v1274_v50, %v4751_v28 }
 0xb88   :  { %v1278_v54 = vpop.f32.mrb[26].mxu0 }
 0xb89   :  { %v1279_v55 = vadd.f32 %v3518_v44, %v1278_v54  ;;  %v3906_v56 = vpop.f32.mrb[27].mxu0  ;;  %v1290_v57 = vsel %vm264_vm3, %v4925_v53, 0.0  ;;  %v1446_v44 = vld [vmem:[%s5316_s2 + $0x8] sm:$0xff] }
 0xb8a   :  { %1291 = vadd.xlane.f32.xlu0 %v1290_v57  ;;  %v4179_v45 = vpack.c.bf16 %v1446_v44, %v1445_v43 }
 0xb8b   :  { %v4930_v58 = vadd.f32 %v1279_v55, %v4755_v32 }
 0xb8c   :  { %4180 = vmatpush3.bf16.msra.mxu1 %v4179_v45  ;;  %v3534_v45 = vld [vmem:[%s4592_s29 + $0x1] ss:$0 sm:$0xff]  ;;  %s5319_s29 = sld [smem:[#allocation17_spill]] }
 0xb8d   :  { %v1293_v59 = vsel %vm264_vm3, %v4930_v58, 0.0  ;;  %4184 = vmatprep.subr.bf16.mxu1 %v4546_v8 }
 0xb8e   :  { %1294 = vadd.xlane.f32.xlu1 %v1293_v59 }
 0xc13   :  { %v1289_v60 = vpop.xlane.xlu1 %1288 }
 0xc14   :  { %v1296_v61 = vmul.f32 0.0625, %v1289_v60 }
 0xc16   :  { %v1299_v62 = vsub.f32 %v4920_v48, %v1296_v61 }
 0xc17   :  { %v1292_v63 = vpop.xlane.xlu0 %1291 }
 0xc18   :  { %v1297_v1 = vmul.f32 0.0625, %v1292_v63  ;;  %v1302_v2 = vmul.f32 %v1299_v62, %v1299_v62 }
 0xc1a   :  { %v1300_v3 = vsub.f32 %v4925_v53, %v1297_v1  ;;  %v1305_v4 = vsel %vm264_vm3, %v1302_v2, 0.0 }
 0xc1b   :  { %1306 = vadd.xlane.f32.xlu0 %v1305_v4  ;;  %v1295_v5 = vpop.xlane.xlu1 %1294 }
 0xc1c   :  { %v1298_v6 = vmul.f32 0.0625, %v1295_v5  ;;  %v1303_v7 = vmul.f32 %v1300_v3, %v1300_v3 }
 0xc1e   :  { %v1301_v9 = vsub.f32 %v4930_v58, %v1298_v6  ;;  %v1308_v10 = vsel %vm264_vm3, %v1303_v7, 0.0 }
 0xc1f   :  { %1309 = vadd.xlane.f32.xlu1 %v1308_v10 }
 0xc20   :  { %v1304_v21 = vmul.f32 %v1301_v9, %v1301_v9 }
 0xc22   :  { %v1311_v11 = vsel %vm264_vm3, %v1304_v21, 0.0 }
 0xc23   :  { %1312 = vadd.xlane.f32.xlu0 %v1311_v11 }
 0xca8   :  { %v1307_v14 = vpop.xlane.xlu0 %1306 }
 0xca9   :  { %v1314_v15 = vmul.f32 0.0625, %v1307_v14 }
 0xcab   :  { %v1317_v16 = vadd.f32 1e-05, %v1314_v15 }
 0xcac   :  { %v1310_v17 = vpop.xlane.xlu1 %1309 }
 0xcad   :  { %4381 = vrsqrt.f32 %v1317_v16  ;;  %v1315_v18 = vmul.f32 0.0625, %v1310_v17 }
 0xcaf   :  { %v1318_v19 = vadd.f32 1e-05, %v1315_v18 }
 0xcb0   :  { %v1313_v20 = vpop.xlane.xlu0 %1312 }
 0xcb1   :  { %4383 = vrsqrt.f32 %v1318_v19  ;;  %v1316_v22 = vmul.f32 0.0625, %v1313_v20 }
 0xcb3   :  { %v1319_v25 = vadd.f32 1e-05, %v1316_v22 }
 0xcb5   :  { %4385 = vrsqrt.f32 %v1319_v25 }
 0xcb7   :  { %v4382_v26 = vpop.eup %4381 }
 0xcb8   :  { %v1323_v29 = vmul.f32 %v4382_v26, %v1299_v62  ;;  %v3528_v62 = vld [vmem:[%s5318_s10] ss:$0 sm:$0xff] }
 0xcba   :  { %v1332_v33 = vmul.f32 %v3522_v27, %v1323_v29 }
 0xcbb   :  { %v4384_v34 = vpop.eup %4383 }
 0xcbc   :  { %v1341_v35 = vadd.f32 %v3523_v31, %v1332_v33  ;;  %v1324_v36 = vmul.f32 %v4384_v34, %v1300_v3  ;;  %v3537_v33 = vld [vmem:[%s4602_s8 + $0x18] sm:$0xff] }
 0xcbe   :  { %3912 = vmatmul.mubr.msk.f32.vlgmr.msra.gmra.mrb[28].mxu0 %vm264_vm3, %v1341_v35  ;;  %v1333_v37 = vmul.f32 %v3522_v27, %v1324_v36 }
 0xcbf   :  { %v4386_v38 = vpop.eup %4385  ;;  %3914 = vmatprep.mubr.msk.f32.mxu0 %vm4545_vm0, %v4544_v0 }
 0xcc0   :  { %v1342_v39 = vadd.f32 %v3523_v31, %v1333_v37  ;;  %v1325_v40 = vmul.f32 %v4386_v38, %v1301_v9 }
 0xcc2   :  { %3915 = vmatmul.mubr.msk.f32.gmra.mrb[30].mxu0 %vm264_vm3, %v1342_v39  ;;  %v1334_v41 = vmul.f32 %v3522_v27, %v1325_v40 }
 0xcc3   :  { %3917 = vmatprep.mubr.msk.f32.mxu0 %vm4545_vm0, %v4544_v0 }
 0xcc4   :  { %v1343_v42 = vadd.f32 %v3523_v31, %v1334_v41  ;;  %v3536_v31 = vld [vmem:[%s4602_s8 + $0x10] sm:$0xff]  ;;  %s5321_s8 = sld [smem:[#allocation19_spill]] }
 0xcc5   :  { %v4182_v34 = vpack.c.bf16 %v3537_v33, %v3536_v31 }
 0xcc6   :  { %3918 = vmatmul.mubr.msk.f32.gmra.mrb[32].mxu0 %vm264_vm3, %v1343_v42 }
 0xcc7   :  { %3937 = vmatprep.mubr.msk.f32.mxu0 %vm4545_vm0, %v4544_v0  ;;  %4183 = vmatpush3.bf16.msra.mxu0 %v4182_v34 }
 0xcc8   :  { %4188 = vmatprep.subr.bf16.mxu0 %v4546_v8 }
 0xd91   :  { %v1428_v47 = vpop.f32.mrb[28].mxu0 }
 0xd92   :  { %v1429_v49 = vadd.f32 %v3524_v46, %v1428_v47  ;;  %v3913_v50 = vpop.f32.mrb[29].mxu0  ;;  %v3535_v47 = vld [vmem:[%s4597_s3 + $0x1] ss:$0 sm:$0xff]  ;;  %s5320_s3 = sld [smem:[#allocation18_spill]] }
 0xd94   :  { %v1442_v51 = vmax.f32 %v1429_v49, 0.0 }
 0xd95   :  { %v1433_v52 = vpop.f32.mrb[30].mxu0 }
 0xd96   :  { %v1434_v54 = vadd.f32 %v3524_v46, %v1433_v52  ;;  %v3916_v55 = vpop.f32.mrb[31].mxu0  ;;  %3925 = vmatmul.mubr.msk.f32.vlgmr.msra.gmra.mrb[26].mxu1 %vm264_vm3, %v1442_v51 }
 0xd97   :  { %3927 = vmatprep.mubr.msk.f32.mxu1 %vm4545_vm0, %v4544_v0 }
 0xd98   :  { %v1443_v56 = vmax.f32 %v1434_v54, 0.0 }
 0xd99   :  { %v1438_v57 = vpop.f32.mrb[32].mxu0 }
 0xd9a   :  { %v1439_v59 = vadd.f32 %v3524_v46, %v1438_v57  ;;  %v3919_v60 = vpop.f32.mrb[33].mxu0  ;;  %3928 = vmatmul.mubr.msk.f32.gmra.mrb[28].mxu1 %vm264_vm3, %v1443_v56 }
 0xd9b   :  { %3930 = vmatprep.mubr.msk.f32.mxu1 %vm4545_vm0, %v4544_v0 }
 0xd9c   :  { %v1444_v61 = vmax.f32 %v1439_v59, 0.0 }
 0xd9e   :  { %3931 = vmatmul.mubr.msk.f32.gmra.mrb[30].mxu1 %vm264_vm3, %v1444_v61 }
 0xd9f   :  { %3952 = vmatprep.mubr.msk.f32.mxu1 %vm4545_vm0, %v4544_v0 }
 0xe69   :  { %v1529_v63 = vpop.f32.mrb[26].mxu1 }
 0xe6a   :  { %v1530_v1 = vadd.f32 %v3528_v62, %v1529_v63  ;;  %v3926_v2 = vpop.f32.mrb[27].mxu1  ;;  %v3539_v63 = vld [vmem:[%s4607_s14 + $0x1] ss:$0 sm:$0xff] }
 0xe6c   :  { %v4969_v3 = vadd.f32 %v1530_v1, %v4920_v48 }
 0xe6d   :  { %v1534_v4 = vpop.f32.mrb[28].mxu1 }
 0xe6e   :  { %v1535_v5 = vadd.f32 %v3528_v62, %v1534_v4  ;;  %v3929_v6 = vpop.f32.mrb[29].mxu1  ;;  %v1550_v7 = vsel %vm264_vm3, %v4969_v3, 0.0 }
 0xe6f   :  { %1551 = vadd.xlane.f32.xlu1 %v1550_v7 }
 0xe70   :  { %v4974_v9 = vadd.f32 %v1535_v5, %v4925_v53 }
 0xe71   :  { %v1539_v10 = vpop.f32.mrb[30].mxu1 }
 0xe72   :  { %v1540_v21 = vadd.f32 %v3528_v62, %v1539_v10  ;;  %v3932_v11 = vpop.f32.mrb[31].mxu1  ;;  %v1553_v23 = vsel %vm264_vm3, %v4974_v9, 0.0 }
 0xe73   :  { %1554 = vadd.xlane.f32.xlu0 %v1553_v23 }
 0xe74   :  { %v4979_v48 = vadd.f32 %v1540_v21, %v4930_v58 }
 0xe76   :  { %v1556_v12 = vsel %vm264_vm3, %v4979_v48, 0.0 }
 0xe77   :  { %1557 = vadd.xlane.f32.xlu1 %v1556_v12 }
 0xefc   :  { %v1552_v13 = vpop.xlane.xlu1 %1551 }
 0xefd   :  { %v1559_v14 = vmul.f32 0.0625, %v1552_v13 }
 0xeff   :  { %v1562_v15 = vsub.f32 %v4969_v3, %v1559_v14 }
 0xf00   :  { %v1555_v53 = vpop.xlane.xlu0 %1554 }
 0xf01   :  { %v1560_v16 = vmul.f32 0.0625, %v1555_v53  ;;  %v1565_v17 = vmul.f32 %v1562_v15, %v1562_v15 }
 0xf03   :  { %v1563_v18 = vsub.f32 %v4974_v9, %v1560_v16  ;;  %v1568_v19 = vsel %vm264_vm3, %v1565_v17, 0.0 }
 0xf04   :  { %1569 = vadd.xlane.f32.xlu0 %v1568_v19  ;;  %v1558_v58 = vpop.xlane.xlu1 %1557 }
 0xf05   :  { %v1561_v20 = vmul.f32 0.0625, %v1558_v58  ;;  %v1566_v22 = vmul.f32 %v1563_v18, %v1563_v18 }
 0xf07   :  { %v1564_v25 = vsub.f32 %v4979_v48, %v1561_v20  ;;  %v1571_v26 = vsel %vm264_vm3, %v1566_v22, 0.0 }
 0xf08   :  { %1572 = vadd.xlane.f32.xlu1 %v1571_v26 }
 0xf09   :  { %v1567_v27 = vmul.f32 %v1564_v25, %v1564_v25 }
 0xf0b   :  { %v1574_v29 = vsel %vm264_vm3, %v1567_v27, 0.0 }
 0xf0c   :  { %1575 = vadd.xlane.f32.xlu0 %v1574_v29 }
 0xf91   :  { %v1570_v35 = vpop.xlane.xlu0 %1569 }
 0xf92   :  { %v1577_v36 = vmul.f32 0.0625, %v1570_v35 }
 0xf94   :  { %v1580_v37 = vadd.f32 1e-05, %v1577_v36 }
 0xf95   :  { %v1573_v38 = vpop.xlane.xlu1 %1572 }
 0xf96   :  { %4387 = vrsqrt.f32 %v1580_v37  ;;  %v1578_v39 = vmul.f32 0.0625, %v1573_v38 }
 0xf98   :  { %v1581_v40 = vadd.f32 1e-05, %v1578_v39 }
 0xf99   :  { %v1576_v41 = vpop.xlane.xlu0 %1575 }
 0xf9a   :  { %4389 = vrsqrt.f32 %v1581_v40  ;;  %v1579_v42 = vmul.f32 0.0625, %v1576_v41 }
 0xf9c   :  { %v1582_v43 = vadd.f32 1e-05, %v1579_v42 }
 0xf9e   :  { %4391 = vrsqrt.f32 %v1582_v43 }
 0xfa0   :  { %v4388_v44 = vpop.eup %4387 }
 0xfa1   :  { %v1586_v46 = vmul.f32 %v4388_v44, %v1562_v15 }
 0xfa3   :  { %v1595_v49 = vmul.f32 %v3534_v45, %v1586_v46 }
 0xfa4   :  { %v4390_v50 = vpop.eup %4389 }
 0xfa5   :  { %v1604_v51 = vadd.f32 %v3535_v47, %v1595_v49  ;;  %v1587_v52 = vmul.f32 %v4390_v50, %v1563_v18 }
 0xfa7   :  { %3938 = vmatmul.mubr.msk.f32.vlgmr.msra.gmra.mrb[34].mxu0 %vm264_vm3, %v1604_v51  ;;  %v1596_v54 = vmul.f32 %v3534_v45, %v1587_v52  ;;  %v3543_v51 = vld [vmem:[%s4612_s19 + $0x20] sm:$0xff]  ;;  %v3544_v52 = vld [vmem:[%s4612_s19 + $0x28] sm:$0xff] }
 0xfa8   :  { %v4392_v55 = vpop.eup %4391  ;;  %3940 = vmatprep.mubr.msk.f32.mxu0 %vm4545_vm0, %v4544_v0 }
 0xfa9   :  { %v1605_v56 = vadd.f32 %v3535_v47, %v1596_v54  ;;  %v1588_v57 = vmul.f32 %v4392_v55, %v1564_v25  ;;  %v4192_v54 = vpack.c.bf16 %v3544_v52, %v3543_v51 }
 0xfab   :  { %3941 = vmatmul.mubr.msk.f32.gmra.mrb[36].mxu0 %vm264_vm3, %v1605_v56  ;;  %v1597_v59 = vmul.f32 %v3534_v45, %v1588_v57 }
 0xfac   :  { %3943 = vmatprep.mubr.msk.f32.mxu0 %vm4545_vm0, %v4544_v0 }
 0xfad   :  { %v1606_v60 = vadd.f32 %v3535_v47, %v1597_v59 }
 0xfaf   :  { %3944 = vmatmul.mubr.msk.f32.gmra.mrb[38].mxu0 %vm264_vm3, %v1606_v60 }
 0xfb0   :  { %3967 = vmatprep.mubr.msk.f32.mxu0 %vm4545_vm0, %v4544_v0 }
0x107a   :  { %v1693_v61 = vpop.f32.mrb[34].mxu0 }
0x107b   :  { %v3939_v62 = vpop.f32.mrb[35].mxu0  ;;  %v5004_v2 = vadd.f32 %v3539_v63, %v1693_v61 }
0x107e   :  { %v1698_v1 = vpop.f32.mrb[36].mxu0 }
0x107f   :  { %v5006_v4 = vadd.f32 %v3539_v63, %v1698_v1  ;;  %v3942_v5 = vpop.f32.mrb[37].mxu0 }
0x1081   :  { %v5010_v6 = vpack.i.bf16 %v5006_v4, %v5004_v2 }
0x1082   :  { %v1703_v7 = vpop.f32.mrb[38].mxu0 }
0x1083   :  { %v5012_v10 = vadd.f32 %v3539_v63, %v1703_v7  ;;  %4330 = vrot.lane.b32.xlu1 %v5010_v6, %s4547_s5  ;;  %v3945_v21 = vpop.f32.mrb[39].mxu0 }
0x1085   :  { %1721 = vrot.lane.b32.xlu0 %v5012_v10, %s4547_s5 }
0x10f5   :  { %v4331_v11 = vpop.permute.xlu1 %4330 }
0x10f6   :  { %v4333_v23 = vunpack.i.h.bf16 %v4331_v11  ;;  %v4332_v12 = vunpack.i.l.bf16 %v4331_v11 }
0x10f7   :  { %v1722_v14 = vpop.permute.xlu0 %1721 }
0x10f8   :  { %v4185_v13 = vpack.c.bf16 %v4333_v23, %v4332_v12 }
0x10fa   :  { %4187 = vmatpush3.bf16.xpose.msk.msra.mxu1 %vm4793_vm4, %v4185_v13 }
0x10fb   :  { %3950 = vmatprep.subr.mxu1 %v4544_v0 }
0x1102   :  { %3951 = vmatpush3.xpose.msk.msra.mxu1 %vm264_vm3, %v1722_v14 }
0x1103   :  { %4191 = vmatprep.subr.bf16.mxu1 %v4546_v8 }
0x1105   :  { %3953 = vmatmul.mubr.msk.f32.vlgmr.msra.gmra.mrb[32].mxu1 %vm264_vm3, %v5004_v2 }
0x1106   :  { %3955 = vmatprep.mubr.msk.f32.mxu1 %vm4545_vm0, %v4544_v0  ;;  %4193 = vmatpush3.bf16.msra.mxu1 %v4192_v54 }
0x1107   :  { %4198 = vmatprep.subr.bf16.mxu1 %v4546_v8 }
0x1109   :  { %3956 = vmatmul.mubr.msk.f32.gmra.mrb[34].mxu1 %vm264_vm3, %v5006_v4 }
0x110a   :  { %3958 = vmatprep.mubr.msk.f32.mxu1 %vm4545_vm0, %v4544_v0 }
0x110d   :  { %3959 = vmatmul.mubr.msk.f32.gmra.mrb[36].mxu1 %vm264_vm3, %v5012_v10 }
0x110e   :  { %3980 = vmatprep.mubr.msk.f32.mxu1 %vm4545_vm0, %v4544_v0 }
0x11d8   :  { %v1801_v15 = vpop.f32.mrb[32].mxu1 }
0x11d9   :  { %v1815_v53 = vmul.f32 0.25, %v1801_v15  ;;  %v3954_v16 = vpop.f32.mrb[33].mxu1 }
0x11db   :  { %v1818_v17 = vsel %vm621_vm5, %v1815_v53, -inf }
0x11dc   :  { %1819 = vmax.xlane.f32.xlu1 %v1818_v17  ;;  %v1806_v18 = vpop.f32.mrb[34].mxu1 }
0x11dd   :  { %v1816_v19 = vmul.f32 0.25, %v1806_v18  ;;  %v3957_v58 = vpop.f32.mrb[35].mxu1 }
0x11df   :  { %v1821_v20 = vsel %vm621_vm5, %v1816_v19, -inf }
0x11e0   :  { %1822 = vmax.xlane.f32.xlu0 %v1821_v20  ;;  %v1811_v22 = vpop.f32.mrb[36].mxu1 }
0x11e1   :  { %v1817_v25 = vmul.f32 0.25, %v1811_v22  ;;  %v3960_v26 = vpop.f32.mrb[37].mxu1 }
0x11e3   :  { %v1824_v27 = vsel %vm621_vm5, %v1817_v25, -inf }
0x11e4   :  { %1825 = vmax.xlane.f32.xlu1 %v1824_v27 }
0x11f5   :  { %4335 = vrot.lane.b32.xlu1 %v5010_v6, %s4548_s13 }
0x1269   :  { %v1820_v29 = vpop.xlane.xlu1 %1819 }
0x126a   :  { %v1827_v31 = vsub.f32 %v1815_v53, %v1820_v29 }
0x126c   :  { %v1830_v33 = vmul.f32 1.442695, %v1827_v31 }
0x126d   :  { %v1823_v34 = vpop.xlane.xlu0 %1822 }
0x126e   :  { %4393 = vpow2.f32 %v1830_v33  ;;  %v1828_v35 = vsub.f32 %v1816_v19, %v1823_v34 }
0x1270   :  { %v1832_v36 = vmul.f32 1.442695, %v1828_v35 }
0x1271   :  { %v1826_v37 = vpop.xlane.xlu1 %1825 }
0x1272   :  { %4395 = vpow2.f32 %v1832_v36  ;;  %v1829_v38 = vsub.f32 %v1817_v25, %v1826_v37 }
0x1274   :  { %v1834_v39 = vmul.f32 1.442695, %v1829_v38 }
0x1275   :  { %v4336_v40 = vpop.permute.xlu1 %4335 }
0x1276   :  { %4397 = vpow2.f32 %v1834_v39  ;;  %v4338_v41 = vunpack.i.h.bf16 %v4336_v40  ;;  %v4337_v42 = vunpack.i.l.bf16 %v4336_v40 }
0x1278   :  { %v4394_v43 = vpop.eup %4393  ;;  %v4189_v44 = vpack.c.bf16 %v4338_v41, %v4337_v42 }
0x1279   :  { %v1836_v45 = vsel %vm621_vm5, %v4394_v43, 0.0 }
0x127a   :  { %1837 = vadd.xlane.f32.xlu0 %v1836_v45  ;;  %4190 = vmatpush3.bf16.msra.mxu0 %v4189_v44 }
0x127b   :  { %3965 = vmatprep.subr.mxu0 %v4544_v0 }
0x127c   :  { %v4396_v46 = vpop.eup %4395 }
0x127d   :  { %v1839_v47 = vsel %vm621_vm5, %v4396_v46, 0.0 }
0x127e   :  { %1840 = vadd.xlane.f32.xlu1 %v1839_v47 }
0x1280   :  { %v4398_v49 = vpop.eup %4397 }
0x1281   :  { %v1842_v50 = vsel %vm621_vm5, %v4398_v49, 0.0 }
0x1282   :  { %1843 = vadd.xlane.f32.xlu0 %v1842_v50 }
0x128f   :  { %4340 = vrot.lane.b32.xlu1 %v5010_v6, %s4549_s17 }
0x1293   :  { %2057 = vrot.lane.b32.xlu1 %v5012_v10, %s4549_s17 }
0x1297   :  { %2047 = vrot.lane.b32.xlu1 %v5004_v2, %s4550_s21 }
0x1298   :  { %1855 = vrot.lane.b32.xlu0 %v5012_v10, %s4548_s13 }
0x129b   :  { %2051 = vrot.lane.b32.xlu1 %v5012_v10, %s4550_s21 }
0x129c   :  { %2049 = vrot.lane.b32.xlu0 %v5006_v4, %s4550_s21 }
0x1307   :  { %v1838_v55 = vpop.xlane.xlu0 %1837 }
0x1308   :  { %4399 = vrcp.f32 %v1838_v55 }
0x130b   :  { %v1841_v56 = vpop.xlane.xlu1 %1840 }
0x130c   :  { %4401 = vrcp.f32 %v1841_v56 }
0x130f   :  { %v1844_v57 = vpop.xlane.xlu0 %1843  ;;  %v4341_v60 = vpop.permute.xlu1 %4340 }
0x1310   :  { %4403 = vrcp.f32 %v1844_v57  ;;  %v4343_v63 = vunpack.i.h.bf16 %v4341_v60  ;;  %v4342_v1 = vunpack.i.l.bf16 %v4341_v60  ;;  %v3545_v60 = vld [vmem:[%s4612_s19 + $0x30] sm:$0xff] }
0x1312   :  { %v4400_v59 = vpop.eup %4399  ;;  %v4195_v5 = vpack.c.bf16 %v4343_v63, %v4342_v1 }
0x1313   :  { %v1848_v61 = vmul.f32 %v4400_v59, %v4394_v43  ;;  %v1856_v62 = vpop.permute.xlu0 %1855  ;;  %v2058_v11 = vpop.permute.xlu1 %2057 }
0x1314   :  { %3966 = vmatpush3.msra.mxu0 %v1856_v62 }
0x1315   :  { %3968 = vmatmul.mubr.msk.f32.vlgmr.msra.gmra.mrb[40].mxu0 %vm621_vm5, %v1848_v61  ;;  %4194 = vmatprep.subr.bf16.mxu0 %v4546_v8  ;;  %v3546_v61 = vld [vmem:[%s4612_s19 + $0x38] sm:$0xff] }
0x1316   :  { %v4402_v2 = vpop.eup %4401  ;;  %3970 = vmatprep.mubr.msk.f32.mxu0 %vm4545_vm0, %v4544_v0 }
0x1317   :  { %v1849_v4 = vmul.f32 %v4402_v2, %v4396_v46  ;;  %v2048_v23 = vpop.permute.xlu1 %2047  ;;  %v2050_v30 = vpop.permute.xlu0 %2049 }
0x1319   :  { %3971 = vmatmul.mubr.msk.f32.gmra.mrb[42].mxu0 %vm621_vm5, %v1849_v4 }
0x131a   :  { %v4404_v7 = vpop.eup %4403  ;;  %3973 = vmatprep.mubr.msk.f32.mxu0 %vm4545_vm0, %v4544_v0 }
0x131b   :  { %4197 = vmatpush3.bf16.xpose.msk.msra.mxu0 %vm4793_vm4, %v4195_v5  ;;  %v1850_v21 = vmul.f32 %v4404_v7, %v4398_v49  ;;  %v2052_v12 = vpop.permute.xlu1 %2051  ;;  %v3573_v7 = vld [vmem:[%s4622_s30 + $0x20] sm:$0xff] }
0x131c   :  { %3993 = vmatprep.subr.mxu0 %v4544_v0 }
0x131d   :  { %3974 = vmatmul.mubr.msk.f32.gmra.mrb[44].mxu0 %vm621_vm5, %v1850_v21  ;;  %v3574_v21 = vld [vmem:[%s4622_s30 + $0x28] sm:$0xff] }
0x131e   :  { %3995 = vmatprep.mubr.msk.f32.mxu0 %vm4545_vm0, %v4544_v0 }
0x1323   :  { %3994 = vmatpush3.xpose.msk.msra.mxu0 %vm264_vm3, %v2058_v11  ;;  %v4205_v11 = vpack.c.bf16 %v3574_v21, %v3573_v7 }
0x1324   :  { %4204 = vmatprep.subr.bf16.mxu0 %v4546_v8 }
0x1326   :  { %3996 = vmatmul.mubr.msk.f32.vlgmr.msra.gmra.mrb[46].mxu0 %vm264_vm3, %v2048_v23 }
0x1327   :  { %3998 = vmatprep.mubr.msk.f32.mxu0 %vm4545_vm0, %v4544_v0  ;;  %4206 = vmatpush3.bf16.msra.mxu0 %v4205_v11 }
0x1328   :  { %4207 = vmatprep.subr.bf16.mxu0 %v4546_v8 }
0x132a   :  { %3999 = vmatmul.mubr.msk.f32.gmra.mrb[48].mxu0 %vm264_vm3, %v2050_v30 }
0x132b   :  { %4001 = vmatprep.mubr.msk.f32.mxu0 %vm4545_vm0, %v4544_v0 }
0x132e   :  { %4002 = vmatmul.mubr.msk.f32.gmra.mrb[50].mxu0 %vm264_vm3, %v2052_v12 }
0x132f   :  { %4040 = vmatprep.mubr.msk.f32.mxu0 %vm4545_vm0, %v4544_v0 }
0x13e8   :  { %v1935_v13 = vpop.f32.mrb[40].mxu0 }
0x13e9   :  { %v3969_v14 = vpop.f32.mrb[41].mxu0  ;;  %3981 = vmatmul.mubr.msk.f32.vlgmr.msra.gmra.mrb[38].mxu1 %vm264_vm3, %v1935_v13 }
0x13ea   :  { %3983 = vmatprep.mubr.msk.f32.mxu1 %vm4545_vm0, %v4544_v0 }
0x13ec   :  { %v1940_v15 = vpop.f32.mrb[42].mxu0 }
0x13ed   :  { %v3972_v53 = vpop.f32.mrb[43].mxu0  ;;  %3984 = vmatmul.mubr.msk.f32.gmra.mrb[40].mxu1 %vm264_vm3, %v1940_v15 }
0x13ee   :  { %3986 = vmatprep.mubr.msk.f32.mxu1 %vm4545_vm0, %v4544_v0  ;;  %v3575_v53 = vld [vmem:[%s4622_s30 + $0x30] sm:$0xff] }
0x13f0   :  { %v1945_v16 = vpop.f32.mrb[44].mxu0 }
0x13f1   :  { %v3975_v17 = vpop.f32.mrb[45].mxu0  ;;  %3987 = vmatmul.mubr.msk.f32.gmra.mrb[42].mxu1 %vm264_vm3, %v1945_v16  ;;  %v3576_v16 = vld [vmem:[%s4622_s30 + $0x38] sm:$0xff]  ;;  %s5323_s30 = sld [smem:[#allocation11_spill]] }
0x13f2   :  { %4010 = vmatprep.mubr.msk.f32.mxu1 %vm4545_vm0, %v4544_v0  ;;  %v4208_v17 = vpack.c.bf16 %v3576_v16, %v3575_v53  ;;  %v3584_v16 = vld [vmem:[%s5314_s28 + $0x1] ss:$0 sm:$0xff] }
0x13f4   :  { %4209 = vmatpush3.bf16.msra.mxu0 %v4208_v17 }
0x13f5   :  { %4210 = vmatprep.subr.bf16.mxu0 %v4546_v8 }
0x13f9   :  { %v2137_v18 = vpop.f32.mrb[46].mxu0 }
0x13fa   :  { %v2151_v19 = vmul.f32 0.25, %v2137_v18  ;;  %v3997_v58 = vpop.f32.mrb[47].mxu0  ;;  %v3560_v18 = vld [vmem:[%s4617_s24 + $0x1] ss:$0 sm:$0xff]  ;;  %s5322_s24 = sld [smem:[#allocation22_spill]] }
0x13fc   :  { %v2154_v20 = vsel %vm621_vm5, %v2151_v19, -inf }
0x13fd   :  { %2155 = vmax.xlane.f32.xlu0 %v2154_v20  ;;  %v2142_v22 = vpop.f32.mrb[48].mxu0 }
0x13fe   :  { %v2152_v25 = vmul.f32 0.25, %v2142_v22  ;;  %v4000_v26 = vpop.f32.mrb[49].mxu0 }
0x1400   :  { %v2157_v27 = vsel %vm621_vm5, %v2152_v25, -inf }
0x1401   :  { %2158 = vmax.xlane.f32.xlu1 %v2157_v27  ;;  %v2147_v29 = vpop.f32.mrb[50].mxu0 }
0x1402   :  { %v2153_v31 = vmul.f32 0.25, %v2147_v29  ;;  %v4003_v33 = vpop.f32.mrb[51].mxu0 }
0x1403   :  { %v3578_v33 = vld [vmem:[%s4627_s6 + $0x1] ss:$0 sm:$0xff] }
0x1404   :  { %v2160_v34 = vsel %vm621_vm5, %v2153_v31, -inf }
0x1405   :  { %2161 = vmax.xlane.f32.xlu0 %v2160_v34 }
0x148a   :  { %v2156_v35 = vpop.xlane.xlu0 %2155 }
0x148b   :  { %v2163_v36 = vsub.f32 %v2151_v19, %v2156_v35 }
0x148d   :  { %v2166_v37 = vmul.f32 1.442695, %v2163_v36 }
0x148e   :  { %v2159_v38 = vpop.xlane.xlu1 %2158 }
0x148f   :  { %4405 = vpow2.f32 %v2166_v37  ;;  %v2164_v39 = vsub.f32 %v2152_v25, %v2159_v38 }
0x1491   :  { %v2168_v40 = vmul.f32 1.442695, %v2164_v39 }
0x1492   :  { %v2162_v41 = vpop.xlane.xlu0 %2161 }
0x1493   :  { %4407 = vpow2.f32 %v2168_v40  ;;  %v2165_v42 = vsub.f32 %v2153_v31, %v2162_v41 }
0x1495   :  { %v2170_v43 = vmul.f32 1.442695, %v2165_v42 }
0x1497   :  { %4409 = vpow2.f32 %v2170_v43 }
0x1499   :  { %v4406_v44 = vpop.eup %4405 }
0x149a   :  { %v2172_v45 = vsel %vm621_vm5, %v4406_v44, 0.0 }
0x149b   :  { %2173 = vadd.xlane.f32.xlu0 %v2172_v45 }
0x149d   :  { %v4408_v46 = vpop.eup %4407 }
0x149e   :  { %v2175_v47 = vsel %vm621_vm5, %v4408_v46, 0.0 }
0x149f   :  { %2176 = vadd.xlane.f32.xlu0 %v2175_v47 }
0x14a1   :  { %v4410_v49 = vpop.eup %4409 }
0x14a2   :  { %v2178_v50 = vsel %vm621_vm5, %v4410_v49, 0.0 }
0x14a3   :  { %2179 = vadd.xlane.f32.xlu1 %v2178_v50 }
0x14b4   :  { %2191 = vrot.lane.b32.xlu1 %v5012_v10, %s4551_s25  ;;  %v4202_v10 = vpack.c.bf16 %v3546_v61, %v3545_v60 }
0x14b5   :  { %4345 = vrot.lane.b32.xlu0 %v5010_v6, %s4551_s25 }
0x1528   :  { %v2174_v51 = vpop.xlane.xlu0 %2173 }
0x1529   :  { %4411 = vrcp.f32 %v2174_v51 }
0x152c   :  { %v2177_v52 = vpop.xlane.xlu0 %2176 }
0x152d   :  { %4413 = vrcp.f32 %v2177_v52 }
0x1530   :  { %v2180_v54 = vpop.xlane.xlu1 %2179  ;;  %v4346_v55 = vpop.permute.xlu0 %4345 }
0x1531   :  { %v4348_v56 = vunpack.i.h.bf16 %v4346_v55  ;;  %v4347_v57 = vunpack.i.l.bf16 %v4346_v55  ;;  %4415 = vrcp.f32 %v2180_v54 }
0x1533   :  { %v4199_v59 = vpack.c.bf16 %v4348_v56, %v4347_v57  ;;  %v4412_v62 = vpop.eup %4411 }
0x1534   :  { %v2184_v63 = vmul.f32 %v4412_v62, %v4406_v44  ;;  %v2192_v6 = vpop.permute.xlu1 %2191 }
0x1535   :  { %4200 = vmatpush3.bf16.msra.mxu1 %v4199_v59 }
0x1536   :  { %4008 = vmatprep.subr.mxu1 %v4544_v0 }
0x1537   :  { %v4414_v1 = vpop.eup %4413 }
0x1538   :  { %v2185_v2 = vmul.f32 %v4414_v1, %v4408_v46 }
0x1539   :  { %4009 = vmatpush3.msra.mxu1 %v2192_v6 }
0x153a   :  { %4011 = vmatmul.mubr.msk.f32.vlgmr.msra.gmra.mrb[44].mxu1 %vm621_vm5, %v2184_v63  ;;  %4201 = vmatprep.subr.bf16.mxu1 %v4546_v8 }
0x153b   :  { %4013 = vmatprep.mubr.msk.f32.mxu1 %vm4545_vm0, %v4544_v0  ;;  %4203 = vmatpush3.bf16.msra.mxu1 %v4202_v10  ;;  %v4416_v4 = vpop.eup %4415 }
0x153c   :  { %4213 = vmatprep.subr.bf16.mxu1 %v4546_v8  ;;  %v2186_v5 = vmul.f32 %v4416_v4, %v4410_v49  ;;  %v3587_v4 = vld [vmem:[%s4642_s27 + $0x18] sm:$0xff] }
0x153e   :  { %4014 = vmatmul.mubr.msk.f32.gmra.mrb[46].mxu1 %vm621_vm5, %v2185_v2  ;;  %v3586_v2 = vld [vmem:[%s4642_s27 + $0x10] sm:$0xff] }
0x153f   :  { %4016 = vmatprep.mubr.msk.f32.mxu1 %vm4545_vm0, %v4544_v0 }
0x1542   :  { %4017 = vmatmul.mubr.msk.f32.gmra.mrb[48].mxu1 %vm621_vm5, %v2186_v5  ;;  %v4211_v5 = vpack.c.bf16 %v3587_v4, %v3586_v2 }
0x1543   :  { %4023 = vmatprep.mubr.msk.f32.mxu1 %vm4545_vm0, %v4544_v0 }
0x160d   :  { %v2271_v23 = vpop.f32.mrb[44].mxu1 }
0x160e   :  { %v4012_v30 = vpop.f32.mrb[45].mxu1  ;;  %4024 = vmatmul.mubr.msk.f32.vlgmr.msra.gmra.mrb[38].mxu1 %vm264_vm3, %v2271_v23 }
0x160f   :  { %4026 = vmatprep.mubr.msk.f32.mxu1 %vm4545_vm0, %v4544_v0 }
0x1611   :  { %v2276_v12 = vpop.f32.mrb[46].mxu1 }
0x1612   :  { %v4015_v13 = vpop.f32.mrb[47].mxu1  ;;  %4027 = vmatmul.mubr.msk.f32.gmra.mrb[40].mxu1 %vm264_vm3, %v2276_v12 }
0x1613   :  { %4029 = vmatprep.mubr.msk.f32.mxu1 %vm4545_vm0, %v4544_v0 }
0x1615   :  { %v2281_v14 = vpop.f32.mrb[48].mxu1 }
0x1616   :  { %v4018_v15 = vpop.f32.mrb[49].mxu1  ;;  %4030 = vmatmul.mubr.msk.f32.gmra.mrb[42].mxu1 %vm264_vm3, %v2281_v14 }
0x1617   :  { %4066 = vmatprep.mubr.msk.f32.mxu1 %vm4545_vm0, %v4544_v0 }
0x16e1   :  { %v2360_v19 = vpop.f32.mrb[38].mxu1 }
0x16e2   :  { %v4233_v58 = vadd.f32 %v3560_v18, %v2360_v19  ;;  %v4025_v20 = vpop.f32.mrb[39].mxu1  ;;  %v2752_v19 = vld [vmem:[%s5319_s29 + $0x18] sm:$0xff] }
0x16e4   :  { %4041 = vmatmul.mubr.msk.f32.vlgmr.msra.gmra.mrb[52].mxu0 %vm1192_vm6, %v4233_v58  ;;  %v3585_v58 = vld [vmem:[%s5315_s1 + $0x1] ss:$0 sm:$0xff] }
0x16e5   :  { %v2365_v22 = vpop.f32.mrb[40].mxu1  ;;  %4043 = vmatprep.mubr.msk.f32.mxu0 %vm4545_vm0, %v4544_v0  ;;  %4212 = vmatpush3.bf16.msra.mxu0 %v4211_v5 }
0x16e6   :  { %v4234_v25 = vadd.f32 %v3560_v18, %v2365_v22  ;;  %v4028_v26 = vpop.f32.mrb[41].mxu1  ;;  %4216 = vmatprep.subr.bf16.mxu0 %v4546_v8 }
0x16e8   :  { %4044 = vmatmul.mubr.msk.f32.gmra.mrb[54].mxu0 %vm1192_vm6, %v4234_v25 }
0x16e9   :  { %v2370_v27 = vpop.f32.mrb[42].mxu1  ;;  %4046 = vmatprep.mubr.msk.f32.mxu0 %vm4545_vm0, %v4544_v0 }
0x16ea   :  { %v4235_v29 = vadd.f32 %v3560_v18, %v2370_v27  ;;  %v4031_v31 = vpop.f32.mrb[43].mxu1  ;;  %v2751_v18 = vld [vmem:[%s5319_s29 + $0x10] sm:$0xff] }
0x16eb   :  { %v4217_v25 = vpack.c.bf16 %v2752_v19, %v2751_v18 }
0x16ec   :  { %4047 = vmatmul.mubr.msk.f32.gmra.mrb[56].mxu0 %vm1192_vm6, %v4235_v29 }
0x16ed   :  { %4053 = vmatprep.mubr.msk.f32.mxu0 %vm4545_vm0, %v4544_v0 }
0x17b7   :  { %v2465_v34 = vpop.f32.mrb[52].mxu0 }
0x17b8   :  { %v2466_v35 = vadd.f32 %v3578_v33, %v2465_v34  ;;  %v4042_v36 = vpop.f32.mrb[53].mxu0 }
0x17ba   :  { %v5143_v37 = vadd.f32 %v2466_v35, %v4969_v3 }
0x17bb   :  { %v2470_v38 = vpop.f32.mrb[54].mxu0 }
0x17bc   :  { %v2471_v39 = vadd.f32 %v3578_v33, %v2470_v38  ;;  %v4045_v40 = vpop.f32.mrb[55].mxu0  ;;  %v2486_v41 = vsel %vm264_vm3, %v5143_v37, 0.0  ;;  %v2749_v38 = vld [vmem:[%s5319_s29] sm:$0xff] }
0x17bd   :  { %2487 = vadd.xlane.f32.xlu1 %v2486_v41 }
0x17be   :  { %v5148_v42 = vadd.f32 %v2471_v39, %v4974_v9  ;;  %v2750_v39 = vld [vmem:[%s5319_s29 + $0x8] sm:$0xff] }
0x17bf   :  { %v2475_v43 = vpop.f32.mrb[56].mxu0  ;;  %v4220_v40 = vpack.c.bf16 %v2750_v39, %v2749_v38 }
0x17c0   :  { %v2476_v44 = vadd.f32 %v3578_v33, %v2475_v43  ;;  %v4048_v45 = vpop.f32.mrb[57].mxu0  ;;  %v2489_v46 = vsel %vm264_vm3, %v5148_v42, 0.0 }
0x17c1   :  { %2490 = vadd.xlane.f32.xlu0 %v2489_v46 }
0x17c2   :  { %v5153_v47 = vadd.f32 %v2476_v44, %v4979_v48 }
0x17c4   :  { %v2492_v49 = vsel %vm264_vm3, %v5153_v47, 0.0 }
0x17c5   :  { %2493 = vadd.xlane.f32.xlu0 %v2492_v49 }
0x184a   :  { %v2488_v50 = vpop.xlane.xlu1 %2487 }
0x184b   :  { %v2495_v51 = vmul.f32 0.0625, %v2488_v50 }
0x184d   :  { %v2498_v52 = vsub.f32 %v5143_v37, %v2495_v51 }
0x184e   :  { %v2491_v54 = vpop.xlane.xlu0 %2490 }
0x184f   :  { %v2496_v55 = vmul.f32 0.0625, %v2491_v54  ;;  %v2501_v56 = vmul.f32 %v2498_v52, %v2498_v52 }
0x1851   :  { %v2499_v57 = vsub.f32 %v5148_v42, %v2496_v55  ;;  %v2504_v59 = vsel %vm264_vm3, %v2501_v56, 0.0  ;;  %v2753_v55 = vld [vmem:[%s5319_s29 + $0x20] sm:$0xff]  ;;  %v2754_v56 = vld [vmem:[%s5319_s29 + $0x28] sm:$0xff] }
0x1852   :  { %2505 = vadd.xlane.f32.xlu1 %v2504_v59  ;;  %v2494_v60 = vpop.xlane.xlu0 %2493  ;;  %v3596_v59 = vld [vmem:[%s5318_s10 + $0x1] ss:$0 sm:$0xff] }
0x1853   :  { %v2497_v61 = vmul.f32 0.0625, %v2494_v60  ;;  %v2502_v62 = vmul.f32 %v2499_v57, %v2499_v57 }
0x1855   :  { %v2500_v10 = vsub.f32 %v5153_v47, %v2497_v61  ;;  %v2507_v63 = vsel %vm264_vm3, %v2502_v62, 0.0 }
0x1856   :  { %2508 = vadd.xlane.f32.xlu0 %v2507_v63 }
0x1857   :  { %v2503_v6 = vmul.f32 %v2500_v10, %v2500_v10 }
0x1859   :  { %v2510_v1 = vsel %vm264_vm3, %v2503_v6, 0.0 }
0x185a   :  { %2511 = vadd.xlane.f32.xlu1 %v2510_v1 }
0x18df   :  { %v2506_v7 = vpop.xlane.xlu1 %2505 }
0x18e0   :  { %v2513_v21 = vmul.f32 0.0625, %v2506_v7 }
0x18e2   :  { %v2516_v11 = vadd.f32 1e-05, %v2513_v21  ;;  %v3028_v21 = vld [vmem:[%s5320_s3] sm:$0xff] }
0x18e3   :  { %v2509_v23 = vpop.xlane.xlu0 %2508 }
0x18e4   :  { %4417 = vrsqrt.f32 %v2516_v11  ;;  %v2514_v30 = vmul.f32 0.0625, %v2509_v23 }
0x18e6   :  { %v2517_v12 = vadd.f32 1e-05, %v2514_v30 }
0x18e7   :  { %v2512_v13 = vpop.xlane.xlu1 %2511 }
0x18e8   :  { %4419 = vrsqrt.f32 %v2517_v12  ;;  %v2515_v14 = vmul.f32 0.0625, %v2512_v13 }
0x18ea   :  { %v2518_v15 = vadd.f32 1e-05, %v2515_v14 }
0x18ec   :  { %4421 = vrsqrt.f32 %v2518_v15 }
0x18ee   :  { %v4418_v53 = vpop.eup %4417 }
0x18ef   :  { %v2522_v17 = vmul.f32 %v4418_v53, %v2498_v52 }
0x18f1   :  { %v2531_v20 = vmul.f32 %v3584_v16, %v2522_v17 }
0x18f2   :  { %v4420_v22 = vpop.eup %4419 }
0x18f3   :  { %v2540_v26 = vadd.f32 %v3585_v58, %v2531_v20  ;;  %v2523_v27 = vmul.f32 %v4420_v22, %v2499_v57  ;;  %v4223_v57 = vpack.c.bf16 %v2754_v56, %v2753_v55 }
0x18f5   :  { %4054 = vmatmul.mubr.msk.f32.vlgmr.msra.gmra.mrb[58].mxu0 %vm264_vm3, %v2540_v26  ;;  %v2532_v29 = vmul.f32 %v3584_v16, %v2523_v27 }
0x18f6   :  { %v4422_v31 = vpop.eup %4421  ;;  %4056 = vmatprep.mubr.msk.f32.mxu0 %vm4545_vm0, %v4544_v0  ;;  %4218 = vmatpush3.bf16.msra.mxu0 %v4217_v25 }
0x18f7   :  { %v2541_v33 = vadd.f32 %v3585_v58, %v2532_v29  ;;  %v2524_v34 = vmul.f32 %v4422_v31, %v2500_v10  ;;  %4219 = vmatprep.subr.bf16.mxu0 %v4546_v8 }
0x18f9   :  { %4057 = vmatmul.mubr.msk.f32.gmra.mrb[60].mxu0 %vm264_vm3, %v2541_v33  ;;  %v2533_v35 = vmul.f32 %v3584_v16, %v2524_v34  ;;  %v3609_v16 = vld [vmem:[%s5321_s8] ss:$0 sm:$0xff] }
0x18fa   :  { %4059 = vmatprep.mubr.msk.f32.mxu0 %vm4545_vm0, %v4544_v0 }
0x18fb   :  { %v2542_v36 = vadd.f32 %v3585_v58, %v2533_v35 }
0x18fd   :  { %4060 = vmatmul.mubr.msk.f32.gmra.mrb[62].mxu0 %vm264_vm3, %v2542_v36 }
0x18fe   :  { %4079 = vmatprep.mubr.msk.f32.mxu0 %vm4545_vm0, %v4544_v0 }
0x1901   :  { %4080 = vmatmul.mubr.msk.f32.vlgmr.msra.gmra.mrb[64].mxu0 %vm264_vm3, %v4969_v3  ;;  %v3593_v3 = vld [vmem:[%s5316_s2 + $0x10] sm:$0xff] }
0x1902   :  { %4082 = vmatprep.mubr.msk.f32.mxu0 %vm4545_vm0, %v4544_v0  ;;  %4221 = vmatpush3.bf16.msra.mxu0 %v4220_v40 }
0x1903   :  { %4222 = vmatprep.subr.bf16.mxu0 %v4546_v8 }
0x1905   :  { %4083 = vmatmul.mubr.msk.f32.gmra.mrb[66].mxu0 %vm264_vm3, %v4974_v9  ;;  %v3594_v9 = vld [vmem:[%s5316_s2 + $0x18] sm:$0xff] }
0x1906   :  { %4085 = vmatprep.mubr.msk.f32.mxu0 %vm4545_vm0, %v4544_v0 }
0x1909   :  { %4086 = vmatmul.mubr.msk.f32.gmra.mrb[68].mxu0 %vm264_vm3, %v4979_v48  ;;  %v4214_v48 = vpack.c.bf16 %v3594_v9, %v3593_v3 }
0x190a   :  { %4092 = vmatprep.mubr.msk.f32.mxu0 %vm4545_vm0, %v4544_v0 }
0x190b   :  { %4215 = vmatpush3.bf16.msra.mxu1 %v4214_v48 }
0x190c   :  { %4114 = vmatprep.subr.mxu1 %v4544_v0 }
0x190d   :  { %4093 = vmatmul.mubr.msk.f32.vlgmr.msra.gmra.mrb[64].mxu0 %vm264_vm3, %v4747_v24  ;;  %v3589_v24 = vld [vmem:[%s5317_s7 + $0x1] ss:$0 sm:$0xff] }
0x190e   :  { %4095 = vmatprep.mubr.msk.f32.mxu0 %vm4545_vm0, %v4544_v0  ;;  %4224 = vmatpush3.bf16.msra.mxu0 %v4223_v57 }
0x1911   :  { %4096 = vmatmul.mubr.msk.f32.gmra.mrb[66].mxu0 %vm264_vm3, %v4751_v28 }
0x1912   :  { %4098 = vmatprep.mubr.msk.f32.mxu0 %vm4545_vm0, %v4544_v0 }
0x1915   :  { %4099 = vmatmul.mubr.msk.f32.gmra.mrb[68].mxu0 %vm264_vm3, %v4755_v32 }
0x1916   :  { %4105 = vmatprep.mubr.msk.f32.mxu0 %vm4545_vm0, %v4544_v0 }
0x19c8   :  { %v2629_v41 = vpop.f32.mrb[58].mxu0 }
0x19c9   :  { %v2630_v43 = vadd.f32 %v3589_v24, %v2629_v41  ;;  %v4055_v44 = vpop.f32.mrb[59].mxu0 }
0x19cb   :  { %v2643_v28 = vmax.f32 %v2630_v43, 0.0 }
0x19cc   :  { %v2634_v45 = vpop.f32.mrb[60].mxu0 }
0x19cd   :  { %v2635_v46 = vadd.f32 %v3589_v24, %v2634_v45  ;;  %v4058_v49 = vpop.f32.mrb[61].mxu0  ;;  %4067 = vmatmul.mubr.msk.f32.vlgmr.msra.gmra.mrb[50].mxu1 %vm264_vm3, %v2643_v28 }
0x19ce   :  { %4069 = vmatprep.mubr.msk.f32.mxu1 %vm4545_vm0, %v4544_v0  ;;  %4115 = vmatpush3.msra.mxu1 %v3028_v21 }
0x19cf   :  { %v2644_v32 = vmax.f32 %v2635_v46, 0.0  ;;  %4225 = vmatprep.subr.bf16.mxu1 %v4546_v8 }
0x19d0   :  { %v2639_v50 = vpop.f32.mrb[62].mxu0 }
0x19d1   :  { %v2640_v51 = vadd.f32 %v3589_v24, %v2639_v50  ;;  %v4061_v52 = vpop.f32.mrb[63].mxu0  ;;  %4070 = vmatmul.mubr.msk.f32.gmra.mrb[52].mxu1 %vm264_vm3, %v2644_v32 }
0x19d2   :  { %4072 = vmatprep.mubr.msk.f32.mxu1 %vm4545_vm0, %v4544_v0 }
0x19d3   :  { %v2645_v54 = vmax.f32 %v2640_v51, 0.0 }
0x19d5   :  { %4073 = vmatmul.mubr.msk.f32.gmra.mrb[54].mxu1 %vm264_vm3, %v2645_v54 }
0x19d6   :  { %4116 = vmatprep.mubr.msk.f32.mxu1 %vm4545_vm0, %v4544_v0 }
0x1aa0   :  { %v2732_v60 = vpop.f32.mrb[50].mxu1 }
0x1aa1   :  { %v2733_v61 = vadd.f32 %v3596_v59, %v2732_v60  ;;  %v4068_v62 = vpop.f32.mrb[51].mxu1  ;;  %v3205_v60 = vld [vmem:[%s5322_s24] sm:$0xff] }
0x1aa3   :  { %v2746_v10 = vadd.f32 %v2733_v61, %v5143_v37  ;;  %v3206_v61 = vld [vmem:[%s5322_s24 + $0x8] sm:$0xff] }
0x1aa4   :  { %v2737_v63 = vpop.f32.mrb[52].mxu1  ;;  %v4226_v62 = vpack.c.bf16 %v3206_v61, %v3205_v60 }
0x1aa5   :  { %v2738_v6 = vadd.f32 %v3596_v59, %v2737_v63  ;;  %v4071_v1 = vpop.f32.mrb[53].mxu1  ;;  %4106 = vmatmul.mubr.msk.f32.vlgmr.msra.gmra.mrb[64].mxu0 %vm264_vm3, %v2746_v10  ;;  %v3306_v10 = vld [vmem:[%s5323_s30] sm:$0xff]  ;;  %v3307_v63 = vld [vmem:[%s5323_s30 + $0x8] sm:$0xff] }
0x1aa6   :  { %4108 = vmatprep.mubr.msk.f32.mxu0 %vm4545_vm0, %v4544_v0  ;;  %v3339_v1 = vsel %vm3338_vm8, %v3306_v10, 0.0 }
0x1aa7   :  { %v2747_v2 = vadd.f32 %v2738_v6, %v5148_v42  ;;  %v3308_v6 = vld [vmem:[%s5323_s30 + $0x10] sm:$0xff] }
0x1aa8   :  { %v2742_v4 = vpop.f32.mrb[54].mxu1 }
0x1aa9   :  { %v2743_v5 = vadd.f32 %v3596_v59, %v2742_v4  ;;  %v4074_v7 = vpop.f32.mrb[55].mxu1  ;;  %4109 = vmatmul.mubr.msk.f32.gmra.mrb[66].mxu0 %vm264_vm3, %v2747_v2  ;;  %v3340_v2 = vsel %vm3338_vm8, %v3307_v63, 0.0  ;;  %v3342_v4 = vsel %vm3338_vm8, %v3308_v6, 0.0 }
0x1aaa   :  { %4111 = vmatprep.mubr.msk.f32.mxu0 %vm4545_vm0, %v4544_v0  ;;  %v3341_v7 = vadd.f32 %v3340_v2, %v3339_v1 }
0x1aab   :  { %v2748_v37 = vadd.f32 %v2743_v5, %v5153_v47  ;;  %v4552_v5 = vmov 0  }
0x1aac   :  { %4349 = vset.pattern.permute.xlu1 %v4552_v5  ;;  %4350 = vset.pattern.permute.xlu0 %v4552_v5 }
0x1aad   :  { %4112 = vmatmul.mubr.msk.f32.gmra.mrb[68].mxu0 %vm264_vm3, %v2748_v37  ;;  %v3343_v37 = vadd.f32 %v3342_v4, %v3341_v7 }
0x1b78   :  { %v3008_v11 = vpop.f32.mrb[64].mxu0 }
0x1b79   :  { %4423 = vtanh.f32 %v3008_v11  ;;  %v4107_v23 = vpop.f32.mrb[65].mxu0 }
0x1b7c   :  { %v3013_v42 = vpop.f32.mrb[66].mxu0 }
0x1b7d   :  { %4425 = vtanh.f32 %v3013_v42  ;;  %v4110_v30 = vpop.f32.mrb[67].mxu0 }
0x1b80   :  { %v3018_v12 = vpop.f32.mrb[68].mxu0 }
0x1b81   :  { %4427 = vtanh.f32 %v3018_v12  ;;  %v4113_v13 = vpop.f32.mrb[69].mxu0 }
0x1b83   :  { %v5235_v14 = vpop.eup %4423 }
0x1b84   :  { %4117 = vmatmul.mubr.msk.f32.vlgmr.msra.gmra.mrb[56].mxu1 %vm3036_vm7, %v5235_v14 }
0x1b85   :  { %4119 = vmatprep.mubr.msk.f32.mxu1 %vm4545_vm0, %v4544_v0  ;;  %4227 = vmatpush3.bf16.msra.mxu1 %v4226_v62 }
0x1b86   :  { %4138 = vmatprep.subr.mxu1 %v4544_v0 }
0x1b87   :  { %v5241_v8 = vpop.eup %4425 }
0x1b88   :  { %4120 = vmatmul.mubr.msk.f32.gmra.mrb[58].mxu1 %vm3036_vm7, %v5241_v8 }
0x1b89   :  { %4122 = vmatprep.mubr.msk.f32.mxu1 %vm4545_vm0, %v4544_v0 }
0x1b8b   :  { %v5247_v47 = vpop.eup %4427 }
0x1b8c   :  { %4123 = vmatmul.mubr.msk.f32.gmra.mrb[60].mxu1 %vm3036_vm7, %v5247_v47 }
0x1b8d   :  { %4129 = vmatprep.mubr.msk.f32.mxu1 %vm4545_vm0, %v4544_v0 }
0x1c57   :  { %v3112_v15 = vpop.f32.mrb[56].mxu1 }
0x1c58   :  { %v4118_v53 = vpop.f32.mrb[57].mxu1  ;;  %v3113_v18 = vadd.f32 %v3609_v16, %v3112_v15 }
0x1c59   :  { %v3613_v53 = vld [vmem:[%s5324_s11] ss:$0 sm:$0xff] }
0x1c5a   :  { %v3126_v25 = vsel %vm264_vm3, %v3113_v18, 0.0 }
0x1c5b   :  { %v3117_v17 = vpop.f32.mrb[58].mxu1 }
0x1c5c   :  { %v3118_v19 = vadd.f32 %v3609_v16, %v3117_v17  ;;  %v4121_v58 = vpop.f32.mrb[59].mxu1 }
0x1c5e   :  { %v3127_v20 = vsel %vm264_vm3, %v3118_v19, 0.0 }
0x1c5f   :  { %v3122_v22 = vpop.f32.mrb[60].mxu1  ;;  %v3128_v29 = vadd.f32 %v3127_v20, %v3126_v25 }
0x1c60   :  { %v3123_v26 = vadd.f32 %v3609_v16, %v3122_v22  ;;  %v4124_v27 = vpop.f32.mrb[61].mxu1 }
0x1c62   :  { %v3129_v31 = vsel %vm264_vm3, %v3123_v26, 0.0 }
0x1c63   :  { %v3130_v33 = vadd.f32 %v3129_v31, %v3128_v29 }
0x1c65   :  { %3131 = vadd.xlane.f32.xlu0 %v3130_v33 }
0x1c69   :  { %3344 = vadd.xlane.f32.xlu0 %v3343_v37 }
0x1c7f   :  { %3316 = vperm.xlu0 %4350, %v3307_v63  }
0x1cf2   :  { %v3132_v34 = vpop.xlane.xlu0 %3131 }
0x1cf3   :  { %v3133_v35 = vrot.slane %v3132_v34, 4 }
0x1cf5   :  { %v3134_v36 = vadd.f32 %v3133_v35, %v3132_v34 }
0x1cf6   :  { %v3345_v34 = vpop.xlane.xlu0 %3344 }
0x1cf7   :  { %v3135_v38 = vrot.slane %v3134_v36, 2  ;;  %v3346_v35 = vrot.slane %v3345_v34, 4 }
0x1cf9   :  { %v3136_v39 = vadd.f32 %v3135_v38, %v3134_v36  ;;  %v3347_v36 = vadd.f32 %v3346_v35, %v3345_v34 }
0x1cfb   :  { %v3137_v40 = vrot.slane %v3136_v39, 1  ;;  %v3348_v38 = vrot.slane %v3347_v36, 2 }
0x1cfd   :  { %v3138_v3 = vadd.f32 %v3137_v40, %v3136_v39  ;;  %v3349_v39 = vadd.f32 %v3348_v38, %v3347_v36 }
0x1cff   :  { %4260 = vpush %v3138_v3  ;;  %v3350_v40 = vrot.slane %v3349_v39, 1 }
0x1d01   :  { %v3351_v3 = vadd.f32 %v3350_v40, %v3349_v39 }
0x1d30   :  { %s4261_s14 = spop %4260 }
0x1d31   :  { %s3142_s19 = smul.f32 0.0026041667, %s4261_s14 }
0x1d33   :  { %v3143_v9 = vstv %s3142_s19 }
0x1d34   :  { %v3144_v48 = vsub.f32 %v3113_v18, %v3143_v9  ;;  %v3145_v24 = vsub.f32 %v3118_v19, %v3143_v9  ;;  %v3146_v41 = vsub.f32 %v3123_v26, %v3143_v9  ;;  %v3614_v18 = vld [vmem:[%s5325_s15] ss:$0 sm:$0xff] }
0x1d35   :  { %v3356_v9 = vld [vmem:[%s4697_s20] sm:$0xff]  ;;  %s4553_s20 = smov [#allocation7]  }
0x1d36   :  { %v3147_v43 = vmul.f32 %v3144_v48, %v3144_v48  ;;  %v3148_v44 = vmul.f32 %v3145_v24, %v3145_v24  ;;  %v3149_v28 = vmul.f32 %v3146_v41, %v3146_v41  ;;  %s3439_s0 = sshll.u32 %s4553_s20, 4  ;;  %s3440_s0 = int_to_ptr.vmem [resolvable:$true] %s3439_s0 }
0x1d37   :  { %s4485_s22 = scalar_lea.vmem %s3440_s0, 16  ;;  %s4489_s23 = scalar_lea.vmem %s3440_s0, 32 }
0x1d38   :  { %v3150_v45 = vsel %vm264_vm3, %v3147_v43, 0.0  ;;  %v3151_v46 = vsel %vm264_vm3, %v3148_v44, 0.0  ;;  %v3153_v32 = vsel %vm264_vm3, %v3149_v28, 0.0  ;;  %p4486_p2 = scmp.ne.s32.totalorder %s3440_s0, %s4485_s22  ;;  %p4490_p3 = scmp.lt.s32.totalorder %s3440_s0, %s3440_s0 }
0x1d39   :  { %v3152_v49 = vadd.f32 %v3151_v46, %v3150_v45  ;;  %p4491_p4 = scmp.lt.s32.totalorder %s4489_s23, %s4485_s22 }
0x1d3b   :  { %v3154_v50 = vadd.f32 %v3153_v32, %v3152_v49  ;;  %v3317_v49 = vpop.permute.xlu0 %3316  ;;  %p4492_p5 = por %p4491_p4, %p4490_p3 }
0x1d3d   :  { %3155 = vadd.xlane.f32.xlu1 %v3154_v50  ;;  %p4493_p6 = pnand %p4492_p5, %p4486_p2 }
0x1d4e   :  { %3311 = vperm.xlu1 %4349, %v3306_v10  }
0x1d52   :  { %3321 = vperm.xlu1 %4349, %v3308_v6  }
0x1dca   :  { %v3156_v51 = vpop.xlane.xlu1 %3155 }
0x1dcb   :  { %v3157_v52 = vrot.slane %v3156_v51, 4 }
0x1dcd   :  { %v3158_v54 = vadd.f32 %v3157_v52, %v3156_v51 }
0x1dce   :  { %v3312_v28 = vpop.permute.xlu1 %3311 }
0x1dcf   :  { %v3159_v55 = vrot.slane %v3158_v54, 2 }
0x1dd1   :  { %v3160_v56 = vadd.f32 %v3159_v55, %v3158_v54 }
0x1dd3   :  { %v3161_v57 = vrot.slane %v3160_v56, 1 }
0x1dd5   :  { %v3162_v59 = vadd.f32 %v3161_v57, %v3160_v56 }
0x1dd7   :  { %4262 = vpush %v3162_v59 }
0x1e08   :  { %s4263_s6 = spop %4262 }
0x1e09   :  { %s3166_s27 = smul.f32 0.0026041667, %s4263_s6 }
0x1e0b   :  { %v3167_v21 = vstv %s3166_s27 }
0x1e0c   :  { %4429 = vrsqrt.f32 %v3167_v21  ;;  %vm3170_vm9 = vcmp.eq.f32.partialorder %v3167_v21, inf  ;;  %v3173_v42 = vand.u32 2147483648, %v3167_v21  ;;  %vm3172_vm10 = vcmp.eq.f32.partialorder %v3167_v21, 0.0 }
0x1e16   :  { %v4430_v11 = vpop.eup %4429 }
0x1e17   :  { %v3169_v23 = vmul.f32 %v4430_v11, %v3167_v21 }
0x1e19   :  { %v3171_v30 = vsel %vm3170_vm9, %v3167_v21, %v3169_v23 }
0x1e1a   :  { %v3174_v12 = vsel %vm3172_vm10, %v3173_v42, %v3171_v30 }
0x1e1b   :  { %4264 = vpush %v3174_v12 }
0x1e1c   :  { %4266 = vpush %v3351_v3 }
0x1e4c   :  { %s4265_s16 = spop %4264 }
0x1e4d   :  { %s3176_s18 = sadd.f32 1e-05, %s4265_s16 }
0x1e4f   :  { %v3177_v13 = vstv %s3176_s18 }
0x1e50   :  { %4431 = vrcp.f32 %v3177_v13 }
0x1e5a   :  { %v4432_v15 = vpop.eup %4431 }
0x1e5b   :  { %v3179_v16 = vmul.f32 %v4432_v15, %v3144_v48  ;;  %v3180_v17 = vmul.f32 %v4432_v15, %v3145_v24  ;;  %v3181_v19 = vmul.f32 %v4432_v15, %v3146_v41  ;;  %v3615_v48 = vld [vmem:[%s4692_s9] ss:$0 sm:$0xff]  ;;  %s4267_s9 = spop %4266 }
0x1e5c   :  { %v3353_v63 = vstv %s4267_s9 }
0x1e5d   :  { %v3189_v58 = vmul.f32 %v3613_v53, %v3179_v16  ;;  %v3190_v20 = vmul.f32 %v3613_v53, %v3180_v17  ;;  %v3191_v25 = vmul.f32 %v3613_v53, %v3181_v19 }
0x1e5f   :  { %v3199_v22 = vadd.f32 %v3614_v18, %v3189_v58  ;;  %v3200_v26 = vadd.f32 %v3614_v18, %v3190_v20  ;;  %v3201_v27 = vadd.f32 %v3614_v18, %v3191_v25 }
0x1e61   :  { %4433 = vtanh.f32 %v3199_v22 }
0x1e62   :  { %4435 = vtanh.f32 %v3200_v26 }
0x1e63   :  { %4437 = vtanh.f32 %v3201_v27 }
0x1e64   :  { %4439 = vrcp.f32 %v3353_v63 }
0x1e6b   :  { %v4434_v29 = vpop.eup %4433 }
0x1e6c   :  { %4130 = vmatmul.mubr.msk.f32.vlgmr.msra.gmra.mrb[62].mxu1 %vm264_vm3, %v4434_v29  ;;  %v4436_v31 = vpop.eup %4435 }
0x1e6d   :  { %4132 = vmatprep.mubr.msk.f32.mxu1 %vm4545_vm0, %v4544_v0  ;;  %v4438_v33 = vpop.eup %4437  ;;  %4139 = vmatpush3.msra.mxu1 %v3356_v9 }
0x1e6e   :  { %v4440_v7 = vpop.eup %4439 }
0x1e70   :  { %4133 = vmatmul.mubr.msk.f32.gmra.mrb[64].mxu1 %vm264_vm3, %v4436_v31 }
0x1e71   :  { %4135 = vmatprep.mubr.msk.f32.mxu1 %vm4545_vm0, %v4544_v0 }
0x1e74   :  { %4136 = vmatmul.mubr.msk.f32.gmra.mrb[66].mxu1 %vm264_vm3, %v4438_v33 }
0x1e75   :  { %4140 = vmatprep.mubr.msk.f32.mxu1 %vm4545_vm0, %v4544_v0 }
0x1f3f   :  { %v3289_v24 = vpop.f32.mrb[62].mxu1 }
0x1f40   :  { %v3290_v41 = vadd.f32 %v3615_v48, %v3289_v24  ;;  %v4131_v43 = vpop.f32.mrb[63].mxu1 }
0x1f42   :  { %v3303_v44 = vadd.f32 %v5235_v14, %v3290_v41  ;;  %v3322_v14 = vpop.permute.xlu1 %3321 }
0x1f43   :  { %v3294_v45 = vpop.f32.mrb[64].mxu1 }
0x1f44   :  { %v3295_v46 = vadd.f32 %v3615_v48, %v3294_v45  ;;  %v4134_v0 = vpop.f32.mrb[65].mxu1  ;;  %v3324_v32 = vmul.f32 %v3312_v28, %v3303_v44 }
0x1f46   :  { %v3304_v50 = vadd.f32 %v5241_v8, %v3295_v46  ;;  %v3327_v56 = vsel %vm3036_vm7, %v3324_v32, 0.0 }
0x1f47   :  { %v3299_v51 = vpop.f32.mrb[66].mxu1 }
0x1f48   :  { %v3325_v52 = vmul.f32 %v3317_v49, %v3304_v50  ;;  %v3300_v54 = vadd.f32 %v3615_v48, %v3299_v51  ;;  %v4137_v55 = vpop.f32.mrb[67].mxu1 }
0x1f4a   :  { %v3328_v57 = vsel %vm3036_vm7, %v3325_v52, 0.0  ;;  %v3305_v59 = vadd.f32 %v5247_v47, %v3300_v54  ;;  %v3357_v47 = vld [vmem:[%s4702_s12] sm:$0x1] }
0x1f4b   :  { %v3329_v60 = vadd.f32 %v3328_v57, %v3327_v56 }
0x1f4c   :  { %v3326_v61 = vmul.f32 %v3322_v14, %v3305_v59 }
0x1f4e   :  { %v3330_v62 = vsel %vm3036_vm7, %v3326_v61, 0.0 }
0x1f4f   :  { %v3331_v10 = vadd.f32 %v3330_v62, %v3329_v60 }
0x1f51   :  { %v3332_v8 = vrot.slane %v3331_v10, 4 }
0x1f53   :  { %v3333_v6 = vadd.f32 %v3332_v8, %v3331_v10 }
0x1f55   :  { %v3334_v1 = vrot.slane %v3333_v6, 2 }
0x1f57   :  { %v3335_v2 = vadd.f32 %v3334_v1, %v3333_v6 }
0x1f59   :  { %v3336_v4 = vrot.slane %v3335_v2, 1 }
0x1f5b   :  { %v3337_v5 = vadd.f32 %v3336_v4, %v3335_v2 }
0x1f5d   :  { %v3355_v37 = vmul.f32 %v4440_v7, %v3337_v5 }
0x1f5f   :  { %4141 = vmatmul.mubr.msk.f32.vlgmr.msra.gmra.mrb[68].mxu1 %vm3036_vm7, %v3355_v37 }
0x2032   :  { %v3427_v21 = vpop.f32.mrb[68].mxu1 }
0x2033   :  { %v3428_v11 = vadd.f32 %v3427_v21, %v3357_v47  ;;  %v4142_v23 = vpop.f32.mrb[69].mxu1 }
0x2035   :  { %3432 = vst.msk [vmem:[#allocation7] sm:$0x1] %vm3431_vm11, %v3428_v11 }
0x2036   :  { %4496 = shalt.err (!%p4493_p6)
}
0x2037   :  { %s4497_s12 = scalar_lea.hbm %s4707_s4, 16 }
0x2038   :  { %p4498_p7 = scmp.ne.s32.totalorder %s4707_s4, %s4497_s12  ;;  %p4501_p8 = scmp.lt.u32.totalorder %s4497_s12, %s4707_s4 }
0x203a   :  { %p4503_p9 = pnand %p4501_p8, %p4498_p7 }
0x203c   :  { %4506 = shalt.err (!%p4503_p9)
}
0x203d   :  { %3442 = dma.vmem_to_hbm [thread:$0]  %s3440_s0, 16, %s4707_s4, [#allocation4]  }
0x203e   :  { %4511 = dma.done.wait [#allocation4], 16  }
0x203f   :  { %4512 = vsyncadd [#allocation4], 4294967280 }
0x2040   :  { %3446 = vsyncpa [#allocation3], 1 }
0x2041   :  { %3447 = vsyncpa [#allocation6], 1 }
0x2042   :  { %3448 = vsyncpa [#allocation4], 1 }

</bundles_post_ra>
